<compile_context>
chip_gen: v7x
topology: tpu7x:2x2x1
jax: 0.10.0
libtpu: 0.0.40
codegen_flags: <defaults>
</compile_context>

<pallas_src>
import jax
import jax.numpy as jnp
from jax.experimental import pallas as pl
from jax.experimental.pallas import tpu as pltpu

EPS = 1e-5
OUT_LANES = 128  # lane-dense output width; logits live in [:, :num_classes]


def _round_up(x, m):
    return ((x + m - 1) // m) * m


# --------------------------- pass 1: BN statistics ---------------------------
def _make_stats_kernel(tb, h2, b_true):
    """Accumulate global (whole-batch) BN stats and emit folded (scale, shift)."""
    inv_b = 1.0 / float(b_true)

    def kernel(x_ref,
               w1_ref, b1_ref, g1_ref, be1_ref,
               w2_ref, b2_ref, g2_ref, be2_ref,
               w3_ref, b3_ref, g3_ref, be3_ref,
               sc1_ref, sh1_ref, sc2_ref, sh2_ref, sc3_ref, sh3_ref,   # outputs
               m1, v1, m2, v2, m3, v3):                                 # scratch
        phase = pl.program_id(0)            # 0: BN1, 1: BN2, 2: BN3
        tile = pl.program_id(1)             # batch tile (innermost)
        last_tile = pl.num_programs(1) - 1

        @pl.when(jnp.logical_and(phase == 0, tile == 0))
        def _init():
            for r in (m1, v1, m2, v2, m3, v3):
                r[...] = jnp.zeros_like(r)

        # Valid-row bookkeeping: zero-padded batch rows must not pollute the stats.
        row = tile * tb + jax.lax.broadcasted_iota(jnp.int32, (tb, 1), 0)
        valid = (row < b_true).astype(jnp.float32)
        cnt = jnp.minimum(b_true - tile * tb, tb).astype(jnp.float32)   # >= 1 always
        n_prev = (tile * tb).astype(jnp.float32)

        def welford_merge(h, mean_ref, m2_ref):
            # Chan/Welford chunk merge: numerically safe vs E[h^2]-E[h]^2.
            hm = h * valid
            mu_t = jnp.sum(hm, axis=0, keepdims=True) / cnt
            d = (h - mu_t) * valid
            m2_t = jnp.sum(d * d, axis=0, keepdims=True)
            w_new = cnt / (n_prev + cnt)
            delta = mu_t - mean_ref[...]
            mean_ref[...] = mean_ref[...] + delta * w_new
            m2_ref[...] = m2_ref[...] + m2_t + (delta * delta) * (n_prev * w_new)

        def finalize(mean_ref, m2_ref, g_ref, be_ref, sc_ref, sh_ref):
            mean = mean_ref[...]
            var = jnp.maximum(m2_ref[...] * inv_b, 0.0)   # biased var (training BN)
            scale = g_ref[...] * jax.lax.rsqrt(var + EPS)
            sc_ref[...] = scale
            sh_ref[...] = be_ref[...] - mean * scale

        x = x_ref[...]
        # ---- block1: Linear -> ReLU (Dropout p=0 is identity) ----
        h1 = jnp.maximum(
            jnp.dot(x, w1_ref[...], preferred_element_type=jnp.float32) + b1_ref[...],
            0.0)

        @pl.when(phase == 0)
        def _bn1_acc():
            welford_merge(h1, m1, v1)

        @pl.when(phase >= 1)
        def _deeper():
            @pl.when(jnp.logical_and(phase == 1, tile == 0))
            def _fin1():                      # hoisted: finalize BN1 exactly once
                finalize(m1, v1, g1_ref, be1_ref, sc1_ref, sh1_ref)

            x1 = h1 * sc1_ref[...] + sh1_ref[...]
            # fused [block2 | skip2] single (H -> 2*H2) matmul
            z2 = jnp.dot(x1, w2_ref[...], preferred_element_type=jnp.float32) + b2_ref[...]
            r2 = jnp.maximum(z2[:, :h2], 0.0)

            @pl.when(phase == 1)
            def _bn2_acc():
                welford_merge(r2, m2, v2)

            @pl.when(phase == 2)
            def _bn3():
                @pl.when(tile == 0)
                def _fin2():
                    finalize(m2, v2, g2_ref, be2_ref, sc2_ref, sh2_ref)

                x2 = r2 * sc2_ref[...] + sh2_ref[...] + z2[:, h2:]
                # fused [block3 | skip3] single (H2 -> 2*H2) matmul
                z3 = jnp.dot(x2, w3_ref[...], preferred_element_type=jnp.float32) + b3_ref[...]
                r3 = jnp.maximum(z3[:, :h2], 0.0)
                welford_merge(r3, m3, v3)

                @pl.when(tile == last_tile)
                def _fin3():
                    finalize(m3, v3, g3_ref, be3_ref, sc3_ref, sh3_ref)

    return kernel


# --------------------------- pass 2: forward ---------------------------------
def _make_fwd_kernel(h2):
    """Full forward with finalized BN (scale, shift); output written exactly once."""
    def kernel(x_ref,
               w1_ref, b1_ref, w2_ref, b2_ref, w3_ref, b3_ref, w4_ref, b4_ref,
               sc1_ref, sh1_ref, sc2_ref, sh2_ref, sc3_ref, sh3_ref,
               o_ref):
        x = x_ref[...]
        h1 = jnp.maximum(
            jnp.dot(x, w1_ref[...], preferred_element_type=jnp.float32) + b1_ref[...],
            0.0)
        x1 = h1 * sc1_ref[...] + sh1_ref[...]
        z2 = jnp.dot(x1, w2_ref[...], preferred_element_type=jnp.float32) + b2_ref[...]
        x2 = jnp.maximum(z2[:, :h2], 0.0) * sc2_ref[...] + sh2_ref[...] + z2[:, h2:]
        z3 = jnp.dot(x2, w3_ref[...], preferred_element_type=jnp.float32) + b3_ref[...]
        x3 = jnp.maximum(z3[:, :h2], 0.0) * sc3_ref[...] + sh3_ref[...] + z3[:, h2:]
        # sigmoid via tanh keeps the transcendental on the EUP slot
        sig = 0.5 * (jnp.tanh(0.5 * x3) + 1.0)
        out = jnp.dot(sig, w4_ref[...], preferred_element_type=jnp.float32) + b4_ref[...]
        o_ref[...] = out.astype(o_ref.dtype)

    return kernel


def heavy_pose_classifier(x, params, *, batch_tile=1024):
    """x: (B, input_size) float32. params: (in,out) weights, (1,out) biases, BN gamma/beta."""
    B, in_features = x.shape
    H = params["w1"].shape[1]
    H2 = params["w2"].shape[1]
    C = params["w4"].shape[1]

    # --- fused / lane-dense parameter layout (done once, outside the kernels) ---
    w1, b1 = params["w1"], params["b1"]
    w2c = jnp.concatenate([params["w2"], params["ws2"]], axis=1)   # (H, 2*H2)
    b2c = jnp.concatenate([params["b2"], params["bs2"]], axis=1)   # (1, 2*H2)
    w3c = jnp.concatenate([params["w3"], params["ws3"]], axis=1)   # (H2, 2*H2)
    b3c = jnp.concatenate([params["b3"], params["bs3"]], axis=1)   # (1, 2*H2)
    w4p = jnp.zeros((H2, OUT_LANES), jnp.float32).at[:, :C].set(params["w4"])
    b4p = jnp.zeros((1, OUT_LANES), jnp.float32).at[:, :C].set(params["b4"])
    g1, be1 = params["g1"], params["beta1"]
    g2, be2 = params["g2"], params["beta2"]
    g3, be3 = params["g3"], params["beta3"]

    # --- batch tiling (TB rows per tile, multiple of 8 sublanes) ---
    TB = min(_round_up(batch_tile, 8), _round_up(B, 8))
    Bp = _round_up(B, TB)
    xp = x if Bp == B else jnp.pad(x, ((0, Bp - B), (0, 0)))
    n_tiles = Bp // TB

    const = lambda *_: (0, 0)   # weights / stats stay VMEM-resident across the grid
    stat_shapes = [(1, H), (1, H), (1, H2), (1, H2), (1, H2), (1, H2)]

    # ---- pass 1: global BN statistics -> folded (scale, shift) vectors ----
    stats = pl.pallas_call(
        _make_stats_kernel(TB, H2, B),
        out_shape=tuple(jax.ShapeDtypeStruct(s, jnp.float32) for s in stat_shapes),
        grid_spec=pltpu.PrefetchScalarGridSpec(
            num_scalar_prefetch=0,
            grid=(3, n_tiles),   # (BN phase, batch tile) -- tiles iterate innermost
            in_specs=[
                pl.BlockSpec((TB, in_features), lambda p, i: (i, 0)),
                pl.BlockSpec(w1.shape, const), pl.BlockSpec(b1.shape, const),
                pl.BlockSpec(g1.shape, const), pl.BlockSpec(be1.shape, const),
                pl.BlockSpec(w2c.shape, const), pl.BlockSpec(b2c.shape, const),
                pl.BlockSpec(g2.shape, const), pl.BlockSpec(be2.shape, const),
                pl.BlockSpec(w3c.shape, const), pl.BlockSpec(b3c.shape, const),
                pl.BlockSpec(g3.shape, const), pl.BlockSpec(be3.shape, const),
            ],
            out_specs=tuple(pl.BlockSpec(s, const) for s in stat_shapes),
            scratch_shapes=[pltpu.VMEM(s, jnp.float32) for s in stat_shapes]),
        compiler_params=pltpu.CompilerParams(
            # Sequential: phase p+1 needs phase p's completed global stats and batch
            # tiles accumulate into shared scratch (see v7x TODO above).
            dimension_semantics=("arbitrary", "arbitrary")),
    )(xp, w1, b1, g1, be1, w2c, b2c, g2, be2, w3c, b3c, g3, be3)
    sc1, sh1, sc2, sh2, sc3, sh3 = stats

    # ---- pass 2: forward with finalized stats; batch tiles are independent ----
    out = pl.pallas_call(
        _make_fwd_kernel(H2),
        out_shape=jax.ShapeDtypeStruct((Bp, OUT_LANES), jnp.float32),
        grid_spec=pltpu.PrefetchScalarGridSpec(
            num_scalar_prefetch=0,
            grid=(n_tiles,),
            in_specs=[
                pl.BlockSpec((TB, in_features), lambda i: (i, 0)),
                pl.BlockSpec(w1.shape, const), pl.BlockSpec(b1.shape, const),
                pl.BlockSpec(w2c.shape, const), pl.BlockSpec(b2c.shape, const),
                pl.BlockSpec(w3c.shape, const), pl.BlockSpec(b3c.shape, const),
                pl.BlockSpec(w4p.shape, const), pl.BlockSpec(b4p.shape, const),
            ] + [pl.BlockSpec(s, const) for s in stat_shapes],
            out_specs=pl.BlockSpec((TB, OUT_LANES), lambda i: (i, 0))),
        compiler_params=pltpu.CompilerParams(
            dimension_semantics=("parallel",)),   # megacore-splittable on v7x
    )(xp, w1, b1, w2c, b2c, w3c, b3c, w4p, b4p, sc1, sh1, sc2, sh2, sc3, sh3)

    return out[:B, :C]


def init_params(key, input_size=32, hidden_dims=64, num_classes=9):
    h2 = hidden_dims // 2
    keys = jax.random.split(key, 6)

    # nn.Linear weights ~ normal_(), biases zero (per _initialize_weights).
    # Weights stored (in, out); biases/BN params kept (1, out) for TPU-friendly layout.
    def w(k, i, o):
        return jax.random.normal(k, (i, o), dtype=jnp.float32)

    return {
        "w1": w(keys[0], input_size, hidden_dims), "b1": jnp.zeros((1, hidden_dims), jnp.float32),
        "w2": w(keys[1], hidden_dims, h2),         "b2": jnp.zeros((1, h2), jnp.float32),
        "ws2": w(keys[2], hidden_dims, h2),        "bs2": jnp.zeros((1, h2), jnp.float32),
        "w3": w(keys[3], h2, h2),                  "b3": jnp.zeros((1, h2), jnp.float32),
        "ws3": w(keys[4], h2, h2),                 "bs3": jnp.zeros((1, h2), jnp.float32),
        "w4": w(keys[5], h2, num_classes),         "b4": jnp.zeros((1, num_classes), jnp.float32),
        # BatchNorm1d affine params (PyTorch init: gamma=1, beta=0)
        "g1": jnp.ones((1, hidden_dims), jnp.float32), "beta1": jnp.zeros((1, hidden_dims), jnp.float32),
        "g2": jnp.ones((1, h2), jnp.float32),          "beta2": jnp.zeros((1, h2), jnp.float32),
        "g3": jnp.ones((1, h2), jnp.float32),          "beta3": jnp.zeros((1, h2), jnp.float32),
    }


def reference_forward(x, p):
    """Pure-JAX reference (training-mode BatchNorm1d with affine, whole-batch stats)."""
    def bn(h, g, b):
        m = jnp.mean(h, axis=0, keepdims=True)
        v = jnp.mean((h - m) ** 2, axis=0, keepdims=True)
        return (h - m) / jnp.sqrt(v + EPS) * g + b

    x1 = bn(jnp.maximum(x @ p["w1"] + p["b1"], 0.0), p["g1"], p["beta1"])
    x2 = bn(jnp.maximum(x1 @ p["w2"] + p["b2"], 0.0), p["g2"], p["beta2"]) + (x1 @ p["ws2"] + p["bs2"])
    x3 = bn(jnp.maximum(x2 @ p["w3"] + p["b3"], 0.0), p["g3"], p["beta3"]) + (x2 @ p["ws3"] + p["bs3"])
    return jax.nn.sigmoid(x3) @ p["w4"] + p["b4"]


if __name__ == "__main__":
    key = jax.random.PRNGKey(0)
    k_x, k_p, k_g1, k_g2, k_g3, k_b1, k_b2, k_b3 = jax.random.split(key, 8)

    B, INPUT_SIZE, HIDDEN, NUM_CLASSES = 24, 32, 64, 9
    x = jax.random.normal(k_x, (B, INPUT_SIZE), dtype=jnp.float32)
    params = init_params(k_p, INPUT_SIZE, HIDDEN, NUM_CLASSES)

    # Perturb BN gamma/beta so the affine path is actually exercised/verified
    # (PyTorch init leaves gamma=1, beta=0, which would hide a missing affine).
    H2 = HIDDEN // 2
    params["g1"] = 1.0 + 0.1 * jax.random.normal(k_g1, (1, HIDDEN), dtype=jnp.float32)
    params["g2"] = 1.0 + 0.1 * jax.random.normal(k_g2, (1, H2), dtype=jnp.float32)
    params["g3"] = 1.0 + 0.1 * jax.random.normal(k_g3, (1, H2), dtype=jnp.float32)
    params["beta1"] = 0.1 * jax.random.normal(k_b1, (1, HIDDEN), dtype=jnp.float32)
    params["beta2"] = 0.1 * jax.random.normal(k_b2, (1, H2), dtype=jnp.float32)
    params["beta3"] = 0.1 * jax.random.normal(k_b3, (1, H2), dtype=jnp.float32)

    ref = reference_forward(x, params)

    # batch_tile=8 -> 3 batch tiles: exercises the multi-tile Welford-merge path.
    out_multi = jax.block_until_ready(heavy_pose_classifier(x, params, batch_tile=8))
    # default tile (single tile at this B): exercises the fast path.
    out_single = jax.block_until_ready(heavy_pose_classifier(x, params))

    for out in (out_multi, out_single):
        assert out.shape == (B, NUM_CLASSES)
        err = float(jnp.max(jnp.abs(out - ref)))
        # Tolerance absorbs TPU matmul-precision / accumulation-order differences
        # between the fused in-kernel dots and the XLA reference.
        assert jnp.allclose(out, ref, atol=5e-3, rtol=5e-3), \
            f"mismatch vs reference (max abs err {err})"

    print("KERNEL_OK")
</pallas_src>

<mosaic_0001>
module attributes {stable_mosaic.version = 11 : i64} {
  func.func @kernel(%arg0: i32, %arg1: i32, %arg2: memref<8x32xf32, #tpu.memory_space<vmem>>, %arg3: memref<32x64xf32, #tpu.memory_space<vmem>>, %arg4: memref<1x64xf32, #tpu.memory_space<vmem>>, %arg5: memref<1x64xf32, #tpu.memory_space<vmem>>, %arg6: memref<1x64xf32, #tpu.memory_space<vmem>>, %arg7: memref<64x64xf32, #tpu.memory_space<vmem>>, %arg8: memref<1x64xf32, #tpu.memory_space<vmem>>, %arg9: memref<1x32xf32, #tpu.memory_space<vmem>>, %arg10: memref<1x32xf32, #tpu.memory_space<vmem>>, %arg11: memref<32x64xf32, #tpu.memory_space<vmem>>, %arg12: memref<1x64xf32, #tpu.memory_space<vmem>>, %arg13: memref<1x32xf32, #tpu.memory_space<vmem>>, %arg14: memref<1x32xf32, #tpu.memory_space<vmem>>, %arg15: memref<1x64xf32, #tpu.memory_space<vmem>>, %arg16: memref<1x64xf32, #tpu.memory_space<vmem>>, %arg17: memref<1x32xf32, #tpu.memory_space<vmem>>, %arg18: memref<1x32xf32, #tpu.memory_space<vmem>>, %arg19: memref<1x32xf32, #tpu.memory_space<vmem>>, %arg20: memref<1x32xf32, #tpu.memory_space<vmem>>, %arg21: memref<1x64xf32, #tpu.memory_space<vmem>>, %arg22: memref<1x64xf32, #tpu.memory_space<vmem>>, %arg23: memref<1x32xf32, #tpu.memory_space<vmem>>, %arg24: memref<1x32xf32, #tpu.memory_space<vmem>>, %arg25: memref<1x32xf32, #tpu.memory_space<vmem>>, %arg26: memref<1x32xf32, #tpu.memory_space<vmem>>) attributes {dimension_semantics = [#tpu.dimension_semantics<arbitrary>, #tpu.dimension_semantics<arbitrary>], iteration_bounds = array<i64: 3, 3>, scalar_prefetch = 0 : i64, scratch_operands = 6 : i64, tpu.core_type = #tpu.core_type<tc>, window_params = [{transform_indices = @transform_0, window_bounds = array<i64: 8, 32>}, {pipeline_mode = #tpu.pipeline_mode<synchronous>, transform_indices = @transform_1, window_bounds = array<i64: 32, 64>}, {pipeline_mode = #tpu.pipeline_mode<synchronous>, transform_indices = @transform_2, window_bounds = array<i64: 1, 64>}, {pipeline_mode = #tpu.pipeline_mode<synchronous>, transform_indices = @transform_3, window_bounds = array<i64: 1, 64>}, {pipeline_mode = #tpu.pipeline_mode<synchronous>, transform_indices = @transform_4, window_bounds = array<i64: 1, 64>}, {pipeline_mode = #tpu.pipeline_mode<synchronous>, transform_indices = @transform_5, window_bounds = array<i64: 64, 64>}, {pipeline_mode = #tpu.pipeline_mode<synchronous>, transform_indices = @transform_6, window_bounds = array<i64: 1, 64>}, {pipeline_mode = #tpu.pipeline_mode<synchronous>, transform_indices = @transform_7, window_bounds = array<i64: 1, 32>}, {pipeline_mode = #tpu.pipeline_mode<synchronous>, transform_indices = @transform_8, window_bounds = array<i64: 1, 32>}, {pipeline_mode = #tpu.pipeline_mode<synchronous>, transform_indices = @transform_9, window_bounds = array<i64: 32, 64>}, {pipeline_mode = #tpu.pipeline_mode<synchronous>, transform_indices = @transform_10, window_bounds = array<i64: 1, 64>}, {pipeline_mode = #tpu.pipeline_mode<synchronous>, transform_indices = @transform_11, window_bounds = array<i64: 1, 32>}, {pipeline_mode = #tpu.pipeline_mode<synchronous>, transform_indices = @transform_12, window_bounds = array<i64: 1, 32>}, {pipeline_mode = #tpu.pipeline_mode<synchronous>, transform_indices = @transform_13, window_bounds = array<i64: 1, 64>}, {pipeline_mode = #tpu.pipeline_mode<synchronous>, transform_indices = @transform_14, window_bounds = array<i64: 1, 64>}, {pipeline_mode = #tpu.pipeline_mode<synchronous>, transform_indices = @transform_15, window_bounds = array<i64: 1, 32>}, {pipeline_mode = #tpu.pipeline_mode<synchronous>, transform_indices = @transform_16, window_bounds = array<i64: 1, 32>}, {pipeline_mode = #tpu.pipeline_mode<synchronous>, transform_indices = @transform_17, window_bounds = array<i64: 1, 32>}, {pipeline_mode = #tpu.pipeline_mode<synchronous>, transform_indices = @transform_18, window_bounds = array<i64: 1, 32>}]} {
    %c0_i32 = arith.constant 0 : i32
    %0 = arith.cmpi eq, %arg0, %c0_i32 : i32
    %c0_i32_0 = arith.constant 0 : i32
    %1 = arith.cmpi eq, %arg1, %c0_i32_0 : i32
    %2 = arith.andi %0, %1 : i1
    %3 = arith.extui %2 : i1 to i32
    %c0_i32_1 = arith.constant 0 : i32
    %4 = arith.cmpi ne, %3, %c0_i32_1 : i32
    scf.if %4 {
      %cst_15 = arith.constant 0.000000e+00 : f32
      %33 = vector.broadcast %cst_15 : f32 to vector<1x64xf32>
      %c0_16 = arith.constant 0 : index
      %c0_17 = arith.constant 0 : index
      %34 = vector.load %arg21[%c0_16, %c0_17] : memref<1x64xf32, #tpu.memory_space<vmem>>, vector<1x64xf32>
      tpu.vector_store %arg21[%c0_16, %c0_17], %33 {strides = array<i32>} : memref<1x64xf32, #tpu.memory_space<vmem>>, vector<1x64xf32>,
      %cst_18 = arith.constant 0.000000e+00 : f32
      %35 = vector.broadcast %cst_18 : f32 to vector<1x64xf32>
      %c0_19 = arith.constant 0 : index
      %c0_20 = arith.constant 0 : index
      %36 = vector.load %arg22[%c0_19, %c0_20] : memref<1x64xf32, #tpu.memory_space<vmem>>, vector<1x64xf32>
      tpu.vector_store %arg22[%c0_19, %c0_20], %35 {strides = array<i32>} : memref<1x64xf32, #tpu.memory_space<vmem>>, vector<1x64xf32>,
      %cst_21 = arith.constant 0.000000e+00 : f32
      %37 = vector.broadcast %cst_21 : f32 to vector<1x32xf32>
      %c0_22 = arith.constant 0 : index
      %c0_23 = arith.constant 0 : index
      %38 = vector.load %arg23[%c0_22, %c0_23] : memref<1x32xf32, #tpu.memory_space<vmem>>, vector<1x32xf32>
      tpu.vector_store %arg23[%c0_22, %c0_23], %37 {strides = array<i32>} : memref<1x32xf32, #tpu.memory_space<vmem>>, vector<1x32xf32>,
      %cst_24 = arith.constant 0.000000e+00 : f32
      %39 = vector.broadcast %cst_24 : f32 to vector<1x32xf32>
      %c0_25 = arith.constant 0 : index
      %c0_26 = arith.constant 0 : index
      %40 = vector.load %arg24[%c0_25, %c0_26] : memref<1x32xf32, #tpu.memory_space<vmem>>, vector<1x32xf32>
      tpu.vector_store %arg24[%c0_25, %c0_26], %39 {strides = array<i32>} : memref<1x32xf32, #tpu.memory_space<vmem>>, vector<1x32xf32>,
      %cst_27 = arith.constant 0.000000e+00 : f32
      %41 = vector.broadcast %cst_27 : f32 to vector<1x32xf32>
      %c0_28 = arith.constant 0 : index
      %c0_29 = arith.constant 0 : index
      %42 = vector.load %arg25[%c0_28, %c0_29] : memref<1x32xf32, #tpu.memory_space<vmem>>, vector<1x32xf32>
      tpu.vector_store %arg25[%c0_28, %c0_29], %41 {strides = array<i32>} : memref<1x32xf32, #tpu.memory_space<vmem>>, vector<1x32xf32>,
      %cst_30 = arith.constant 0.000000e+00 : f32
      %43 = vector.broadcast %cst_30 : f32 to vector<1x32xf32>
      %c0_31 = arith.constant 0 : index
      %c0_32 = arith.constant 0 : index
      %44 = vector.load %arg26[%c0_31, %c0_32] : memref<1x32xf32, #tpu.memory_space<vmem>>, vector<1x32xf32>
      tpu.vector_store %arg26[%c0_31, %c0_32], %43 {strides = array<i32>} : memref<1x32xf32, #tpu.memory_space<vmem>>, vector<1x32xf32>,
    } else {
    }
    %c8_i32 = arith.constant 8 : i32
    %5 = arith.muli %arg1, %c8_i32 : i32
    %6 = tpu.iota {dimensions = array<i32: 0>} : vector<8x1xi32>
    %7 = vector.broadcast %5 : i32 to vector<8x1xi32>
    %8 = arith.addi %7, %6 : vector<8x1xi32>
    %c24_i32 = arith.constant 24 : i32
    %9 = vector.broadcast %c24_i32 : i32 to vector<8x1xi32>
    %10 = arith.cmpi slt, %8, %9 : vector<8x1xi32>
    %11 = arith.extui %10 : vector<8x1xi1> to vector<8x1xi32>
    %12 = arith.sitofp %11 : vector<8x1xi32> to vector<8x1xf32>
    %c8_i32_2 = arith.constant 8 : i32
    %13 = arith.muli %arg1, %c8_i32_2 : i32
    %c24_i32_3 = arith.constant 24 : i32
    %14 = arith.subi %c24_i32_3, %13 : i32
    %c8_i32_4 = arith.constant 8 : i32
    %15 = arith.minsi %14, %c8_i32_4 : i32
    %16 = arith.sitofp %15 : i32 to f32
    %c8_i32_5 = arith.constant 8 : i32
    %17 = arith.muli %arg1, %c8_i32_5 : i32
    %18 = arith.sitofp %17 : i32 to f32
    %c0 = arith.constant 0 : index
    %c0_6 = arith.constant 0 : index
    %19 = vector.load %arg2[%c0, %c0_6] : memref<8x32xf32, #tpu.memory_space<vmem>>, vector<8x32xf32>
    %c0_7 = arith.constant 0 : index
    %c0_8 = arith.constant 0 : index
    %20 = vector.load %arg3[%c0_7, %c0_8] : memref<32x64xf32, #tpu.memory_space<vmem>>, vector<32x64xf32>
    %cst = arith.constant dense<0.000000e+00> : vector<8x64xf32>
    %21 = tpu.matmul %19, %20, %cst {dimension_numbers = #tpu.dot_dimension_numbers<[1], [0], [0], [1], [0, 0, 1, 1], [], []>} : vector<8x32xf32>, vector<32x64xf32>, vector<8x64xf32> -> vector<8x64xf32>
    %c0_9 = arith.constant 0 : index
    %c0_10 = arith.constant 0 : index
    %22 = vector.load %arg4[%c0_9, %c0_10] : memref<1x64xf32, #tpu.memory_space<vmem>>, vector<1x64xf32>
    %23 = vector.broadcast %22 : vector<1x64xf32> to vector<8x64xf32>
    %24 = arith.addf %21, %23 : vector<8x64xf32>
    %cst_11 = arith.constant 0.000000e+00 : f32
    %25 = vector.broadcast %cst_11 : f32 to vector<8x64xf32>
    %26 = arith.maximumf %24, %25 : vector<8x64xf32>
    %c0_i32_12 = arith.constant 0 : i32
    %27 = arith.cmpi eq, %arg0, %c0_i32_12 : i32
    %28 = arith.extui %27 : i1 to i32
    %c0_i32_13 = arith.constant 0 : i32
    %29 = arith.cmpi ne, %28, %c0_i32_13 : i32
    scf.if %29 {
      %33 = vector.broadcast %12 : vector<8x1xf32> to vector<8x64xf32>
      %34 = arith.mulf %26, %33 : vector<8x64xf32>
      %cst_15 = arith.constant dense<0.000000e+00> : vector<64xf32>
      %35 = vector.multi_reduction <add>, %34, %cst_15 [0] : vector<8x64xf32> to vector<64xf32>
      %36 = vector.shape_cast %35 : vector<64xf32> to vector<1x64xf32>
      %37 = vector.broadcast %16 : f32 to vector<1x64xf32>
      %38 = arith.divf %36, %37 : vector<1x64xf32>
      %39 = vector.broadcast %38 : vector<1x64xf32> to vector<8x64xf32>
      %40 = arith.subf %26, %39 : vector<8x64xf32>
      %41 = vector.broadcast %12 : vector<8x1xf32> to vector<8x64xf32>
      %42 = arith.mulf %40, %41 : vector<8x64xf32>
      %43 = arith.mulf %42, %42 : vector<8x64xf32>
      %cst_16 = arith.constant dense<0.000000e+00> : vector<64xf32>
      %44 = vector.multi_reduction <add>, %43, %cst_16 [0] : vector<8x64xf32> to vector<64xf32>
      %45 = vector.shape_cast %44 : vector<64xf32> to vector<1x64xf32>
      %46 = arith.addf %18, %16 : f32
      %47 = arith.divf %16, %46 : f32
      %c0_17 = arith.constant 0 : index
      %c0_18 = arith.constant 0 : index
      %48 = vector.load %arg21[%c0_17, %c0_18] : memref<1x64xf32, #tpu.memory_space<vmem>>, vector<1x64xf32>
      %49 = arith.subf %38, %48 : vector<1x64xf32>
      %c0_19 = arith.constant 0 : index
      %c0_20 = arith.constant 0 : index
      %50 = vector.load %arg21[%c0_19, %c0_20] : memref<1x64xf32, #tpu.memory_space<vmem>>, vector<1x64xf32>
      %51 = vector.broadcast %47 : f32 to vector<1x64xf32>
      %52 = arith.mulf %49, %51 : vector<1x64xf32>
      %53 = arith.addf %50, %52 : vector<1x64xf32>
      %c0_21 = arith.constant 0 : index
      %c0_22 = arith.constant 0 : index
      %54 = vector.load %arg21[%c0_21, %c0_22] : memref<1x64xf32, #tpu.memory_space<vmem>>, vector<1x64xf32>
      tpu.vector_store %arg21[%c0_21, %c0_22], %53 {strides = array<i32>} : memref<1x64xf32, #tpu.memory_space<vmem>>, vector<1x64xf32>,
      %c0_23 = arith.constant 0 : index
      %c0_24 = arith.constant 0 : index
      %55 = vector.load %arg22[%c0_23, %c0_24] : memref<1x64xf32, #tpu.memory_space<vmem>>, vector<1x64xf32>
      %56 = arith.addf %55, %45 : vector<1x64xf32>
      %57 = arith.mulf %49, %49 : vector<1x64xf32>
      %58 = arith.mulf %18, %47 : f32
      %59 = vector.broadcast %58 : f32 to vector<1x64xf32>
      %60 = arith.mulf %57, %59 : vector<1x64xf32>
      %61 = arith.addf %56, %60 : vector<1x64xf32>
      %c0_25 = arith.constant 0 : index
      %c0_26 = arith.constant 0 : index
      %62 = vector.load %arg22[%c0_25, %c0_26] : memref<1x64xf32, #tpu.memory_space<vmem>>, vector<1x64xf32>
      tpu.vector_store %arg22[%c0_25, %c0_26], %61 {strides = array<i32>} : memref<1x64xf32, #tpu.memory_space<vmem>>, vector<1x64xf32>,
    } else {
    }
    %c1_i32 = arith.constant 1 : i32
    %30 = arith.cmpi sge, %arg0, %c1_i32 : i32
    %31 = arith.extui %30 : i1 to i32
    %c0_i32_14 = arith.constant 0 : i32
    %32 = arith.cmpi ne, %31, %c0_i32_14 : i32
    scf.if %32 {
      %c1_i32_15 = arith.constant 1 : i32
      %33 = arith.cmpi eq, %arg0, %c1_i32_15 : i32
      %c0_i32_16 = arith.constant 0 : i32
      %34 = arith.cmpi eq, %arg1, %c0_i32_16 : i32
      %35 = arith.andi %33, %34 : i1
      %36 = arith.extui %35 : i1 to i32
      %c0_i32_17 = arith.constant 0 : i32
      %37 = arith.cmpi ne, %36, %c0_i32_17 : i32
      scf.if %37 {
        %c0_31 = arith.constant 0 : index
        %c0_32 = arith.constant 0 : index
        %58 = vector.load %arg21[%c0_31, %c0_32] : memref<1x64xf32, #tpu.memory_space<vmem>>, vector<1x64xf32>
        %c0_33 = arith.constant 0 : index
        %c0_34 = arith.constant 0 : index
        %59 = vector.load %arg22[%c0_33, %c0_34] : memref<1x64xf32, #tpu.memory_space<vmem>>, vector<1x64xf32>
        %cst_35 = arith.constant 0.0416666679 : f32
        %60 = vector.broadcast %cst_35 : f32 to vector<1x64xf32>
        %61 = arith.mulf %59, %60 : vector<1x64xf32>
        %cst_36 = arith.constant 0.000000e+00 : f32
        %62 = vector.broadcast %cst_36 : f32 to vector<1x64xf32>
        %63 = arith.maximumf %61, %62 : vector<1x64xf32>
        %c0_37 = arith.constant 0 : index
        %c0_38 = arith.constant 0 : index
        %64 = vector.load %arg5[%c0_37, %c0_38] : memref<1x64xf32, #tpu.memory_space<vmem>>, vector<1x64xf32>
        %cst_39 = arith.constant 9.99999974E-6 : f32
        %65 = vector.broadcast %cst_39 : f32 to vector<1x64xf32>
        %66 = arith.addf %63, %65 : vector<1x64xf32>
        %67 = math.rsqrt %66 : vector<1x64xf32>
        %68 = arith.mulf %64, %67 : vector<1x64xf32>
        %c0_40 = arith.constant 0 : index
        %c0_41 = arith.constant 0 : index
        %69 = vector.load %arg15[%c0_40, %c0_41] : memref<1x64xf32, #tpu.memory_space<vmem>>, vector<1x64xf32>
        tpu.vector_store %arg15[%c0_40, %c0_41], %68 {strides = array<i32>} : memref<1x64xf32, #tpu.memory_space<vmem>>, vector<1x64xf32>,
        %c0_42 = arith.constant 0 : index
        %c0_43 = arith.constant 0 : index
        %70 = vector.load %arg6[%c0_42, %c0_43] : memref<1x64xf32, #tpu.memory_space<vmem>>, vector<1x64xf32>
        %71 = arith.mulf %58, %68 : vector<1x64xf32>
        %72 = arith.subf %70, %71 : vector<1x64xf32>
        %c0_44 = arith.constant 0 : index
        %c0_45 = arith.constant 0 : index
        %73 = vector.load %arg16[%c0_44, %c0_45] : memref<1x64xf32, #tpu.memory_space<vmem>>, vector<1x64xf32>
        tpu.vector_store %arg16[%c0_44, %c0_45], %72 {strides = array<i32>} : memref<1x64xf32, #tpu.memory_space<vmem>>, vector<1x64xf32>,
      } else {
      }
      %c0_18 = arith.constant 0 : index
      %c0_19 = arith.constant 0 : index
      %38 = vector.load %arg15[%c0_18, %c0_19] : memref<1x64xf32, #tpu.memory_space<vmem>>, vector<1x64xf32>
      %39 = vector.broadcast %38 : vector<1x64xf32> to vector<8x64xf32>
      %40 = arith.mulf %26, %39 : vector<8x64xf32>
      %c0_20 = arith.constant 0 : index
      %c0_21 = arith.constant 0 : index
      %41 = vector.load %arg16[%c0_20, %c0_21] : memref<1x64xf32, #tpu.memory_space<vmem>>, vector<1x64xf32>
      %42 = vector.broadcast %41 : vector<1x64xf32> to vector<8x64xf32>
      %43 = arith.addf %40, %42 : vector<8x64xf32>
      %c0_22 = arith.constant 0 : index
      %c0_23 = arith.constant 0 : index
      %44 = vector.load %arg7[%c0_22, %c0_23] : memref<64x64xf32, #tpu.memory_space<vmem>>, vector<64x64xf32>
      %cst_24 = arith.constant dense<0.000000e+00> : vector<8x64xf32>
      %45 = tpu.matmul %43, %44, %cst_24 {dimension_numbers = #tpu.dot_dimension_numbers<[1], [0], [0], [1], [0, 0, 1, 1], [], []>} : vector<8x64xf32>, vector<64x64xf32>, vector<8x64xf32> -> vector<8x64xf32>
      %c0_25 = arith.constant 0 : index
      %c0_26 = arith.constant 0 : index
      %46 = vector.load %arg8[%c0_25, %c0_26] : memref<1x64xf32, #tpu.memory_space<vmem>>, vector<1x64xf32>
      %47 = vector.broadcast %46 : vector<1x64xf32> to vector<8x64xf32>
      %48 = arith.addf %45, %47 : vector<8x64xf32>
      %49 = vector.extract_strided_slice %48 {offsets = [0, 0], sizes = [8, 32], strides = [1, 1]} : vector<8x64xf32> to vector<8x32xf32>
      %cst_27 = arith.constant 0.000000e+00 : f32
      %50 = vector.broadcast %cst_27 : f32 to vector<8x32xf32>
      %51 = arith.maximumf %49, %50 : vector<8x32xf32>
      %c1_i32_28 = arith.constant 1 : i32
      %52 = arith.cmpi eq, %arg0, %c1_i32_28 : i32
      %53 = arith.extui %52 : i1 to i32
      %c0_i32_29 = arith.constant 0 : i32
      %54 = arith.cmpi ne, %53, %c0_i32_29 : i32
      scf.if %54 {
        %58 = vector.broadcast %12 : vector<8x1xf32> to vector<8x32xf32>
        %59 = arith.mulf %51, %58 : vector<8x32xf32>
        %cst_31 = arith.constant dense<0.000000e+00> : vector<32xf32>
        %60 = vector.multi_reduction <add>, %59, %cst_31 [0] : vector<8x32xf32> to vector<32xf32>
        %61 = vector.shape_cast %60 : vector<32xf32> to vector<1x32xf32>
        %62 = vector.broadcast %16 : f32 to vector<1x32xf32>
        %63 = arith.divf %61, %62 : vector<1x32xf32>
        %64 = vector.broadcast %63 : vector<1x32xf32> to vector<8x32xf32>
        %65 = arith.subf %51, %64 : vector<8x32xf32>
        %66 = vector.broadcast %12 : vector<8x1xf32> to vector<8x32xf32>
        %67 = arith.mulf %65, %66 : vector<8x32xf32>
        %68 = arith.mulf %67, %67 : vector<8x32xf32>
        %cst_32 = arith.constant dense<0.000000e+00> : vector<32xf32>
        %69 = vector.multi_reduction <add>, %68, %cst_32 [0] : vector<8x32xf32> to vector<32xf32>
        %70 = vector.shape_cast %69 : vector<32xf32> to vector<1x32xf32>
        %71 = arith.addf %18, %16 : f32
        %72 = arith.divf %16, %71 : f32
        %c0_33 = arith.constant 0 : index
        %c0_34 = arith.constant 0 : index
        %73 = vector.load %arg23[%c0_33, %c0_34] : memref<1x32xf32, #tpu.memory_space<vmem>>, vector<1x32xf32>
        %74 = arith.subf %63, %73 : vector<1x32xf32>
        %c0_35 = arith.constant 0 : index
        %c0_36 = arith.constant 0 : index
        %75 = vector.load %arg23[%c0_35, %c0_36] : memref<1x32xf32, #tpu.memory_space<vmem>>, vector<1x32xf32>
        %76 = vector.broadcast %72 : f32 to vector<1x32xf32>
        %77 = arith.mulf %74, %76 : vector<1x32xf32>
        %78 = arith.addf %75, %77 : vector<1x32xf32>
        %c0_37 = arith.constant 0 : index
        %c0_38 = arith.constant 0 : index
        %79 = vector.load %arg23[%c0_37, %c0_38] : memref<1x32xf32, #tpu.memory_space<vmem>>, vector<1x32xf32>
        tpu.vector_store %arg23[%c0_37, %c0_38], %78 {strides = array<i32>} : memref<1x32xf32, #tpu.memory_space<vmem>>, vector<1x32xf32>,
        %c0_39 = arith.constant 0 : index
        %c0_40 = arith.constant 0 : index
        %80 = vector.load %arg24[%c0_39, %c0_40] : memref<1x32xf32, #tpu.memory_space<vmem>>, vector<1x32xf32>
        %81 = arith.addf %80, %70 : vector<1x32xf32>
        %82 = arith.mulf %74, %74 : vector<1x32xf32>
        %83 = arith.mulf %18, %72 : f32
        %84 = vector.broadcast %83 : f32 to vector<1x32xf32>
        %85 = arith.mulf %82, %84 : vector<1x32xf32>
        %86 = arith.addf %81, %85 : vector<1x32xf32>
        %c0_41 = arith.constant 0 : index
        %c0_42 = arith.constant 0 : index
        %87 = vector.load %arg24[%c0_41, %c0_42] : memref<1x32xf32, #tpu.memory_space<vmem>>, vector<1x32xf32>
        tpu.vector_store %arg24[%c0_41, %c0_42], %86 {strides = array<i32>} : memref<1x32xf32, #tpu.memory_space<vmem>>, vector<1x32xf32>,
      } else {
      }
      %c2_i32 = arith.constant 2 : i32
      %55 = arith.cmpi eq, %arg0, %c2_i32 : i32
      %56 = arith.extui %55 : i1 to i32
      %c0_i32_30 = arith.constant 0 : i32
      %57 = arith.cmpi ne, %56, %c0_i32_30 : i32
      scf.if %57 {
        %c0_i32_31 = arith.constant 0 : i32
        %58 = arith.cmpi eq, %arg1, %c0_i32_31 : i32
        %59 = arith.extui %58 : i1 to i32
        %c0_i32_32 = arith.constant 0 : i32
        %60 = arith.cmpi ne, %59, %c0_i32_32 : i32
        scf.if %60 {
          %c0_57 = arith.constant 0 : index
          %c0_58 = arith.constant 0 : index
          %110 = vector.load %arg23[%c0_57, %c0_58] : memref<1x32xf32, #tpu.memory_space<vmem>>, vector<1x32xf32>
          %c0_59 = arith.constant 0 : index
          %c0_60 = arith.constant 0 : index
          %111 = vector.load %arg24[%c0_59, %c0_60] : memref<1x32xf32, #tpu.memory_space<vmem>>, vector<1x32xf32>
          %cst_61 = arith.constant 0.0416666679 : f32
          %112 = vector.broadcast %cst_61 : f32 to vector<1x32xf32>
          %113 = arith.mulf %111, %112 : vector<1x32xf32>
          %cst_62 = arith.constant 0.000000e+00 : f32
          %114 = vector.broadcast %cst_62 : f32 to vector<1x32xf32>
          %115 = arith.maximumf %113, %114 : vector<1x32xf32>
          %c0_63 = arith.constant 0 : index
          %c0_64 = arith.constant 0 : index
          %116 = vector.load %arg9[%c0_63, %c0_64] : memref<1x32xf32, #tpu.memory_space<vmem>>, vector<1x32xf32>
          %cst_65 = arith.constant 9.99999974E-6 : f32
          %117 = vector.broadcast %cst_65 : f32 to vector<1x32xf32>
          %118 = arith.addf %115, %117 : vector<1x32xf32>
          %119 = math.rsqrt %118 : vector<1x32xf32>
          %120 = arith.mulf %116, %119 : vector<1x32xf32>
          %c0_66 = arith.constant 0 : index
          %c0_67 = arith.constant 0 : index
          %121 = vector.load %arg17[%c0_66, %c0_67] : memref<1x32xf32, #tpu.memory_space<vmem>>, vector<1x32xf32>
          tpu.vector_store %arg17[%c0_66, %c0_67], %120 {strides = array<i32>} : memref<1x32xf32, #tpu.memory_space<vmem>>, vector<1x32xf32>,
          %c0_68 = arith.constant 0 : index
          %c0_69 = arith.constant 0 : index
          %122 = vector.load %arg10[%c0_68, %c0_69] : memref<1x32xf32, #tpu.memory_space<vmem>>, vector<1x32xf32>
          %123 = arith.mulf %110, %120 : vector<1x32xf32>
          %124 = arith.subf %122, %123 : vector<1x32xf32>
          %c0_70 = arith.constant 0 : index
          %c0_71 = arith.constant 0 : index
          %125 = vector.load %arg18[%c0_70, %c0_71] : memref<1x32xf32, #tpu.memory_space<vmem>>, vector<1x32xf32>
          tpu.vector_store %arg18[%c0_70, %c0_71], %124 {strides = array<i32>} : memref<1x32xf32, #tpu.memory_space<vmem>>, vector<1x32xf32>,
        } else {
        }
        %c0_33 = arith.constant 0 : index
        %c0_34 = arith.constant 0 : index
        %61 = vector.load %arg17[%c0_33, %c0_34] : memref<1x32xf32, #tpu.memory_space<vmem>>, vector<1x32xf32>
        %62 = vector.broadcast %61 : vector<1x32xf32> to vector<8x32xf32>
        %63 = arith.mulf %51, %62 : vector<8x32xf32>
        %c0_35 = arith.constant 0 : index
        %c0_36 = arith.constant 0 : index
        %64 = vector.load %arg18[%c0_35, %c0_36] : memref<1x32xf32, #tpu.memory_space<vmem>>, vector<1x32xf32>
        %65 = vector.broadcast %64 : vector<1x32xf32> to vector<8x32xf32>
        %66 = arith.addf %63, %65 : vector<8x32xf32>
        %67 = vector.extract_strided_slice %48 {offsets = [0, 32], sizes = [8, 32], strides = [1, 1]} : vector<8x64xf32> to vector<8x32xf32>
        %68 = arith.addf %66, %67 : vector<8x32xf32>
        %c0_37 = arith.constant 0 : index
        %c0_38 = arith.constant 0 : index
        %69 = vector.load %arg11[%c0_37, %c0_38] : memref<32x64xf32, #tpu.memory_space<vmem>>, vector<32x64xf32>
        %cst_39 = arith.constant dense<0.000000e+00> : vector<8x64xf32>
        %70 = tpu.matmul %68, %69, %cst_39 {dimension_numbers = #tpu.dot_dimension_numbers<[1], [0], [0], [1], [0, 0, 1, 1], [], []>} : vector<8x32xf32>, vector<32x64xf32>, vector<8x64xf32> -> vector<8x64xf32>
        %c0_40 = arith.constant 0 : index
        %c0_41 = arith.constant 0 : index
        %71 = vector.load %arg12[%c0_40, %c0_41] : memref<1x64xf32, #tpu.memory_space<vmem>>, vector<1x64xf32>
        %72 = vector.broadcast %71 : vector<1x64xf32> to vector<8x64xf32>
        %73 = arith.addf %70, %72 : vector<8x64xf32>
        %74 = vector.extract_strided_slice %73 {offsets = [0, 0], sizes = [8, 32], strides = [1, 1]} : vector<8x64xf32> to vector<8x32xf32>
        %cst_42 = arith.constant 0.000000e+00 : f32
        %75 = vector.broadcast %cst_42 : f32 to vector<8x32xf32>
        %76 = arith.maximumf %74, %75 : vector<8x32xf32>
        %77 = vector.broadcast %12 : vector<8x1xf32> to vector<8x32xf32>
        %78 = arith.mulf %76, %77 : vector<8x32xf32>
        %cst_43 = arith.constant dense<0.000000e+00> : vector<32xf32>
        %79 = vector.multi_reduction <add>, %78, %cst_43 [0] : vector<8x32xf32> to vector<32xf32>
        %80 = vector.shape_cast %79 : vector<32xf32> to vector<1x32xf32>
        %81 = vector.broadcast %16 : f32 to vector<1x32xf32>
        %82 = arith.divf %80, %81 : vector<1x32xf32>
        %83 = vector.broadcast %82 : vector<1x32xf32> to vector<8x32xf32>
        %84 = arith.subf %76, %83 : vector<8x32xf32>
        %85 = vector.broadcast %12 : vector<8x1xf32> to vector<8x32xf32>
        %86 = arith.mulf %84, %85 : vector<8x32xf32>
        %87 = arith.mulf %86, %86 : vector<8x32xf32>
        %cst_44 = arith.constant dense<0.000000e+00> : vector<32xf32>
        %88 = vector.multi_reduction <add>, %87, %cst_44 [0] : vector<8x32xf32> to vector<32xf32>
        %89 = vector.shape_cast %88 : vector<32xf32> to vector<1x32xf32>
        %90 = arith.addf %18, %16 : f32
        %91 = arith.divf %16, %90 : f32
        %c0_45 = arith.constant 0 : index
        %c0_46 = arith.constant 0 : index
        %92 = vector.load %arg25[%c0_45, %c0_46] : memref<1x32xf32, #tpu.memory_space<vmem>>, vector<1x32xf32>
        %93 = arith.subf %82, %92 : vector<1x32xf32>
        %c0_47 = arith.constant 0 : index
        %c0_48 = arith.constant 0 : index
        %94 = vector.load %arg25[%c0_47, %c0_48] : memref<1x32xf32, #tpu.memory_space<vmem>>, vector<1x32xf32>
        %95 = vector.broadcast %91 : f32 to vector<1x32xf32>
        %96 = arith.mulf %93, %95 : vector<1x32xf32>
        %97 = arith.addf %94, %96 : vector<1x32xf32>
        %c0_49 = arith.constant 0 : index
        %c0_50 = arith.constant 0 : index
        %98 = vector.load %arg25[%c0_49, %c0_50] : memref<1x32xf32, #tpu.memory_space<vmem>>, vector<1x32xf32>
        tpu.vector_store %arg25[%c0_49, %c0_50], %97 {strides = array<i32>} : memref<1x32xf32, #tpu.memory_space<vmem>>, vector<1x32xf32>,
        %c0_51 = arith.constant 0 : index
        %c0_52 = arith.constant 0 : index
        %99 = vector.load %arg26[%c0_51, %c0_52] : memref<1x32xf32, #tpu.memory_space<vmem>>, vector<1x32xf32>
        %100 = arith.addf %99, %89 : vector<1x32xf32>
        %101 = arith.mulf %93, %93 : vector<1x32xf32>
        %102 = arith.mulf %18, %91 : f32
        %103 = vector.broadcast %102 : f32 to vector<1x32xf32>
        %104 = arith.mulf %101, %103 : vector<1x32xf32>
        %105 = arith.addf %100, %104 : vector<1x32xf32>
        %c0_53 = arith.constant 0 : index
        %c0_54 = arith.constant 0 : index
        %106 = vector.load %arg26[%c0_53, %c0_54] : memref<1x32xf32, #tpu.memory_space<vmem>>, vector<1x32xf32>
        tpu.vector_store %arg26[%c0_53, %c0_54], %105 {strides = array<i32>} : memref<1x32xf32, #tpu.memory_space<vmem>>, vector<1x32xf32>,
        %c2_i32_55 = arith.constant 2 : i32
        %107 = arith.cmpi eq, %arg1, %c2_i32_55 : i32
        %108 = arith.extui %107 : i1 to i32
        %c0_i32_56 = arith.constant 0 : i32
        %109 = arith.cmpi ne, %108, %c0_i32_56 : i32
        scf.if %109 {
          %c0_57 = arith.constant 0 : index
          %c0_58 = arith.constant 0 : index
          %110 = vector.load %arg25[%c0_57, %c0_58] : memref<1x32xf32, #tpu.memory_space<vmem>>, vector<1x32xf32>
          %c0_59 = arith.constant 0 : index
          %c0_60 = arith.constant 0 : index
          %111 = vector.load %arg26[%c0_59, %c0_60] : memref<1x32xf32, #tpu.memory_space<vmem>>, vector<1x32xf32>
          %cst_61 = arith.constant 0.0416666679 : f32
          %112 = vector.broadcast %cst_61 : f32 to vector<1x32xf32>
          %113 = arith.mulf %111, %112 : vector<1x32xf32>
          %cst_62 = arith.constant 0.000000e+00 : f32
          %114 = vector.broadcast %cst_62 : f32 to vector<1x32xf32>
          %115 = arith.maximumf %113, %114 : vector<1x32xf32>
          %c0_63 = arith.constant 0 : index
          %c0_64 = arith.constant 0 : index
          %116 = vector.load %arg13[%c0_63, %c0_64] : memref<1x32xf32, #tpu.memory_space<vmem>>, vector<1x32xf32>
          %cst_65 = arith.constant 9.99999974E-6 : f32
          %117 = vector.broadcast %cst_65 : f32 to vector<1x32xf32>
          %118 = arith.addf %115, %117 : vector<1x32xf32>
          %119 = math.rsqrt %118 : vector<1x32xf32>
          %120 = arith.mulf %116, %119 : vector<1x32xf32>
          %c0_66 = arith.constant 0 : index
          %c0_67 = arith.constant 0 : index
          %121 = vector.load %arg19[%c0_66, %c0_67] : memref<1x32xf32, #tpu.memory_space<vmem>>, vector<1x32xf32>
          tpu.vector_store %arg19[%c0_66, %c0_67], %120 {strides = array<i32>} : memref<1x32xf32, #tpu.memory_space<vmem>>, vector<1x32xf32>,
          %c0_68 = arith.constant 0 : index
          %c0_69 = arith.constant 0 : index
          %122 = vector.load %arg14[%c0_68, %c0_69] : memref<1x32xf32, #tpu.memory_space<vmem>>, vector<1x32xf32>
          %123 = arith.mulf %110, %120 : vector<1x32xf32>
          %124 = arith.subf %122, %123 : vector<1x32xf32>
          %c0_70 = arith.constant 0 : index
          %c0_71 = arith.constant 0 : index
          %125 = vector.load %arg20[%c0_70, %c0_71] : memref<1x32xf32, #tpu.memory_space<vmem>>, vector<1x32xf32>
          tpu.vector_store %arg20[%c0_70, %c0_71], %124 {strides = array<i32>} : memref<1x32xf32, #tpu.memory_space<vmem>>, vector<1x32xf32>,
        } else {
        }
      } else {
      }
    } else {
    }
    return
  }
  func.func @transform_0(%arg0: i32, %arg1: i32) -> (i32, i32) {
    %c0_i32 = arith.constant 0 : i32
    %c0_i32_0 = arith.constant 0 : i32
    return %arg1, %c0_i32 : i32, i32
  }
  func.func @transform_1(%arg0: i32, %arg1: i32) -> (i32, i32) {
    %c0_i32 = arith.constant 0 : i32
    %c0_i32_0 = arith.constant 0 : i32
    %c0_i32_1 = arith.constant 0 : i32
    return %c0_i32, %c0_i32_0 : i32, i32
  }
  func.func @transform_2(%arg0: i32, %arg1: i32) -> (i32, i32) {
    %c0_i32 = arith.constant 0 : i32
    %c0_i32_0 = arith.constant 0 : i32
    %c0_i32_1 = arith.constant 0 : i32
    return %c0_i32, %c0_i32_0 : i32, i32
  }
  func.func @transform_3(%arg0: i32, %arg1: i32) -> (i32, i32) {
    %c0_i32 = arith.constant 0 : i32
    %c0_i32_0 = arith.constant 0 : i32
    %c0_i32_1 = arith.constant 0 : i32
    return %c0_i32, %c0_i32_0 : i32, i32
  }
  func.func @transform_4(%arg0: i32, %arg1: i32) -> (i32, i32) {
    %c0_i32 = arith.constant 0 : i32
    %c0_i32_0 = arith.constant 0 : i32
    %c0_i32_1 = arith.constant 0 : i32
    return %c0_i32, %c0_i32_0 : i32, i32
  }
  func.func @transform_5(%arg0: i32, %arg1: i32) -> (i32, i32) {
    %c0_i32 = arith.constant 0 : i32
    %c0_i32_0 = arith.constant 0 : i32
    %c0_i32_1 = arith.constant 0 : i32
    return %c0_i32, %c0_i32_0 : i32, i32
  }
  func.func @transform_6(%arg0: i32, %arg1: i32) -> (i32, i32) {
    %c0_i32 = arith.constant 0 : i32
    %c0_i32_0 = arith.constant 0 : i32
    %c0_i32_1 = arith.constant 0 : i32
    return %c0_i32, %c0_i32_0 : i32, i32
  }
  func.func @transform_7(%arg0: i32, %arg1: i32) -> (i32, i32) {
    %c0_i32 = arith.constant 0 : i32
    %c0_i32_0 = arith.constant 0 : i32
    %c0_i32_1 = arith.constant 0 : i32
    return %c0_i32, %c0_i32_0 : i32, i32
  }
  func.func @transform_8(%arg0: i32, %arg1: i32) -> (i32, i32) {
    %c0_i32 = arith.constant 0 : i32
    %c0_i32_0 = arith.constant 0 : i32
    %c0_i32_1 = arith.constant 0 : i32
    return %c0_i32, %c0_i32_0 : i32, i32
  }
  func.func @transform_9(%arg0: i32, %arg1: i32) -> (i32, i32) {
    %c0_i32 = arith.constant 0 : i32
    %c0_i32_0 = arith.constant 0 : i32
    %c0_i32_1 = arith.constant 0 : i32
    return %c0_i32, %c0_i32_0 : i32, i32
  }
  func.func @transform_10(%arg0: i32, %arg1: i32) -> (i32, i32) {
    %c0_i32 = arith.constant 0 : i32
    %c0_i32_0 = arith.constant 0 : i32
    %c0_i32_1 = arith.constant 0 : i32
    return %c0_i32, %c0_i32_0 : i32, i32
  }
  func.func @transform_11(%arg0: i32, %arg1: i32) -> (i32, i32) {
    %c0_i32 = arith.constant 0 : i32
    %c0_i32_0 = arith.constant 0 : i32
    %c0_i32_1 = arith.constant 0 : i32
    return %c0_i32, %c0_i32_0 : i32, i32
  }
  func.func @transform_12(%arg0: i32, %arg1: i32) -> (i32, i32) {
    %c0_i32 = arith.constant 0 : i32
    %c0_i32_0 = arith.constant 0 : i32
    %c0_i32_1 = arith.constant 0 : i32
    return %c0_i32, %c0_i32_0 : i32, i32
  }
  func.func @transform_13(%arg0: i32, %arg1: i32) -> (i32, i32) {
    %c0_i32 = arith.constant 0 : i32
    %c0_i32_0 = arith.constant 0 : i32
    %c0_i32_1 = arith.constant 0 : i32
    return %c0_i32, %c0_i32_0 : i32, i32
  }
  func.func @transform_14(%arg0: i32, %arg1: i32) -> (i32, i32) {
    %c0_i32 = arith.constant 0 : i32
    %c0_i32_0 = arith.constant 0 : i32
    %c0_i32_1 = arith.constant 0 : i32
    return %c0_i32, %c0_i32_0 : i32, i32
  }
  func.func @transform_15(%arg0: i32, %arg1: i32) -> (i32, i32) {
    %c0_i32 = arith.constant 0 : i32
    %c0_i32_0 = arith.constant 0 : i32
    %c0_i32_1 = arith.constant 0 : i32
    return %c0_i32, %c0_i32_0 : i32, i32
  }
  func.func @transform_16(%arg0: i32, %arg1: i32) -> (i32, i32) {
    %c0_i32 = arith.constant 0 : i32
    %c0_i32_0 = arith.constant 0 : i32
    %c0_i32_1 = arith.constant 0 : i32
    return %c0_i32, %c0_i32_0 : i32, i32
  }
  func.func @transform_17(%arg0: i32, %arg1: i32) -> (i32, i32) {
    %c0_i32 = arith.constant 0 : i32
    %c0_i32_0 = arith.constant 0 : i32
    %c0_i32_1 = arith.constant 0 : i32
    return %c0_i32, %c0_i32_0 : i32, i32
  }
  func.func @transform_18(%arg0: i32, %arg1: i32) -> (i32, i32) {
    %c0_i32 = arith.constant 0 : i32
    %c0_i32_0 = arith.constant 0 : i32
    %c0_i32_1 = arith.constant 0 : i32
    return %c0_i32, %c0_i32_0 : i32, i32
  }
}

</mosaic_0001>

<bundles_post_ra>
// kernel: tpu_custom_call.1
= control target key start
LH: loop header
LB: loop body
LE: loop exit
PB: predicated region body
PF: predicated region fallthrough
CT: control target
= control target key end

     0   :  { %s2876_s0 = inlined_call_operand.hbm [shape: f32[24,32], index: 0, kind: input, shape index: {}]   ;;  %s2877_s1 = inlined_call_operand.hbm [shape: f32[32,64], index: 1, kind: input, shape index: {}]   ;;  %s2878_s2 = inlined_call_operand.vmem [shape: f32[1,64], index: 2, kind: input, shape index: {}]   ;;  %s2879_s3 = inlined_call_operand.vmem [shape: f32[1,64], index: 3, kind: input, shape index: {}]   ;;  %s2880_s4 = inlined_call_operand.hbm [shape: f32[1,64], index: 4, kind: input, shape index: {}]   ;;  %s2881_s5 = inlined_call_operand.hbm [shape: f32[64,64], index: 5, kind: input, shape index: {}]   ;;  %s2882_s6 = inlined_call_operand.hbm [shape: f32[1,64], index: 6, kind: input, shape index: {}]   ;;  %s2883_s7 = inlined_call_operand.hbm [shape: f32[1,32], index: 7, kind: input, shape index: {}]   ;;  %s2884_s8 = inlined_call_operand.hbm [shape: f32[1,32], index: 8, kind: input, shape index: {}]   ;;  %s2885_s9 = inlined_call_operand.vmem [shape: f32[32,64], index: 9, kind: input, shape index: {}]   ;;  %s2886_s10 = inlined_call_operand.vmem [shape: f32[1,64], index: 10, kind: input, shape index: {}]   ;;  %s2887_s11 = inlined_call_operand.vmem [shape: f32[1,32], index: 11, kind: input, shape index: {}]   ;;  %s2888_s12 = inlined_call_operand.vmem [shape: f32[1,32], index: 12, kind: input, shape index: {}]   ;;  %s2889_s13 = inlined_call_operand.hbm [shape: f32[1,64], index: 13, kind: output, shape index: {0}]   ;;  %s2890_s14 = inlined_call_operand.hbm [shape: f32[1,64], index: 14, kind: output, shape index: {1}]   ;;  %s2891_s15 = inlined_call_operand.hbm [shape: f32[1,32], index: 15, kind: output, shape index: {2}]   ;;  %s2892_s16 = inlined_call_operand.hbm [shape: f32[1,32], index: 16, kind: output, shape index: {3}]   ;;  %s2893_s17 = inlined_call_operand.hbm [shape: f32[1,32], index: 17, kind: output, shape index: {4}]   ;;  %s2894_s18 = inlined_call_operand.hbm [shape: f32[1,32], index: 18, kind: output, shape index: {5}]  }
   0x1   :  { %2910 = sst [smem:[#allocation38_spill]] %s2876_s0 }
   0x2   :  { %2911 = sst [smem:[#allocation39_spill]] %s2877_s1 }
   0x3   :  { %2912 = sst [smem:[#allocation40_spill]] %s2878_s2 }
   0x4   :  { %2913 = sst [smem:[#allocation41_spill]] %s2879_s3 }
   0x5   :  { %2914 = sst [smem:[#allocation42_spill]] %s2880_s4 }
   0x6   :  { %2915 = sst [smem:[#allocation43_spill]] %s2881_s5 }
   0x7   :  { %2916 = sst [smem:[#allocation44_spill]] %s2885_s9 }
   0x8   :  { %2917 = sst [smem:[#allocation45_spill]] %s2886_s10 }
   0x9   :  { %2918 = sst [smem:[#allocation46_spill]] %s2887_s11 }
   0xa   :  { %2919 = sst [smem:[#allocation47_spill]] %s2888_s12 }
   0xb   :  { %2920 = sst [smem:[#allocation48_spill]] %s2889_s13 }
   0xc   :  { %2921 = sst [smem:[#allocation49_spill]] %s2890_s14 }
   0xd   :  { %2922 = sst [smem:[#allocation50_spill]] %s2891_s15 }
   0xe   :  { %2923 = sst [smem:[#allocation51_spill]] %s2892_s16 }
   0xf   :  { %2924 = sst [smem:[#allocation52_spill]] %s2893_s17 }
  0x10   :  { %2925 = sst [smem:[#allocation53_spill]] %s2894_s18 }
  0x11   :  { %24 = vsyncpa [#allocation9], 0 }
  0x12   :  { %26 = vsyncpa [#allocation9 + $0x1], 0 }
  0x13   :  { %27 = vsyncpa [#allocation12], 0 }
  0x14   :  { %28 = vsyncpa [#allocation15], 0 }
  0x15   :  { %29 = vsyncpa [#allocation18], 0 }
  0x16   :  { %30 = vsyncpa [#allocation10], 0 }
  0x17   :  { %31 = vsyncpa [#allocation22], 0 }
  0x18   :  { %32 = vsyncpa [#allocation25], 0 }
  0x19   :  { %33 = vsyncpa [#allocation28], 0  ;;  %s2327_s27 = smov 0   ;;  %s2329_s28 = smov 0  }
  0x1a   :  { %s2331_s29 = smov 0   ;;  %s2333_s30 = smov 0  }
  0x1b   :  { %s2335_s0 = smov 0   ;;  %s2337_s19 = smov 0  }
  0x1c   :  { %s2339_s1 = smov 0   ;;  %s2341_s20 = smov 0  }
  0x1d LB: > { %2926 = sst [smem:[#allocation37_spill]] %s2188_s30  ;;  %s2897_s21 = sadd.s32 4294967295, %s2204_s20   ;;  %s2204_s20 = sphi %s2341_s20, %s39_s20   ;;  %s2200_s1 = sphi %s2339_s1, %s2970_s1   ;;  %s2196_s19 = sphi %s2337_s19, %s2969_s19   ;;  %s2192_s0 = sphi %s2335_s0, %s2968_s0   ;;  %s2188_s30 = sphi %s2333_s30, %s2967_s30   ;;  %s2184_s29 = sphi %s2331_s29, %s2966_s29   ;;  %s2180_s28 = sphi %s2329_s28, %s2965_s28   ;;  %s2176_s27 = sphi %s2327_s27, %s2964_s27  }
  0x1e   : > { %p1411_p0 = scmp.ge.s32.totalorder %s2204_s20, 1  ;;  %p2371_p1 = scmp.eq.s32.totalorder %s2897_s21, 0 }
  0x1f   : > { %p460_p2 = scmp.lt.s32.totalorder %s2204_s20, 10  ;;  %s2206_s23 = smov [#allocation11]  }
  0x20   : > { %s2927_s22 = scalar_select %p2371_p1, 1, 0 }
  0x21   : > { %p2376_p3 = pnand %p1411_p0, %p460_p2  ;;  %s472_s24 = sshll.u32 %s2206_s23, 4  ;;  %s2380_s24 = int_to_ptr.vmem [resolvable:$true] %s472_s24 }
  0x22   : > { %s2207_s26 = smov [#allocation14]   ;;  %s2208_s18 = smov [#allocation17]  }
  0x23   : > { %s2928_s2 = scalar_select %p2376_p3, 1, 0 }
  0x24   : > { %p1601_p4 = pneg %p2376_p3  ;;  %s502_s21 = sshll.u32 %s2207_s26, 4  ;;  %s2390_s21 = int_to_ptr.vmem [resolvable:$true] %s502_s21 }
  0x25   : > { %s2392_s17 = sshll.u32 %s2208_s18, 4  ;;  %s2930_s23 = sld [smem:[#allocation39_spill]]  ;;  %s528_s17 = int_to_ptr.vmem [resolvable:$true] %s2392_s17 }
  0x26   : > { %p2386_p5 = pnand %p1601_p4, %p2371_p1 }
  0x28   : > { %p2402_p7 = pneg %p2386_p5 }
  0x2b   : > { %s1756_s16 = scalar_lea.hbm %s2930_s23, 512 }
  0x2c   : > { %p1757_p6 = scmp.ne.s32.totalorder %s2930_s23, %s1756_s16  ;;  %p1763_p10 = scmp.lt.u32.totalorder %s1756_s16, %s2930_s23 }
  0x2e   : > { %p1759_p8 = pnand %p2402_p7, %p1757_p6 }
  0x30   : > { %p1760_p9 = pneg %p1759_p8 }
  0x32   : > { %p1765_p11 = pnand %p1763_p10, %p1760_p9 }
  0x34   : > { %1768 = shalt.err (!%p1765_p11)
}
  0x35   : > { %s1769_s12 = scalar_lea.vmem %s2380_s24, 512  ;;  %p1777_p2 = scmp.lt.s32.totalorder %s2380_s24, %s2380_s24 }
  0x36   : > { %p1770_p12 = scmp.ne.s32.totalorder %s2380_s24, %s1769_s12  ;;  %p1778_p4 = scmp.lt.s32.totalorder %s1769_s12, %s1769_s12 }
  0x38   : > { %p1772_p13 = pnand %p1770_p12, %p2402_p7  ;;  %p1779_p6 = por %p1778_p4, %p1777_p2 }
  0x3a   : > { %p1773_p0 = pneg %p1772_p13 }
  0x3c   : > { %p1780_p8 = pnand %p1779_p6, %p1773_p0 }
  0x3e   : > { %1783 = shalt.err (!%p1780_p8)
}
  0x3f   : > { %s2209_s13 = smov 128   ;;  %s2210_s14 = smov 8  }
  0x40   : > { %1604 = dma.hbm_to_vmem [thread:$0]  (!%p2386_p5), %s2930_s23, 512, %s2380_s24, [#allocation12], %s2209_s13, %s2209_s13, %s2210_s14  }
  0x41   : > { %s2932_s5 = sld [smem:[#allocation43_spill]] }
  0x47   : > { %s1784_s10 = scalar_lea.hbm %s2932_s5, 1024 }
  0x48   : > { %p1785_p9 = scmp.ne.s32.totalorder %s2932_s5, %s1784_s10  ;;  %p1791_p12 = scmp.lt.u32.totalorder %s1784_s10, %s2932_s5 }
  0x4a   : > { %p1787_p10 = pnand %p1785_p9, %p2402_p7 }
  0x4c   : > { %p1788_p11 = pneg %p1787_p10 }
  0x4e   : > { %p1793_p13 = pnand %p1791_p12, %p1788_p11 }
  0x50   : > { %1796 = shalt.err (!%p1793_p13)
}
  0x51   : > { %s1797_s24 = scalar_lea.vmem %s2390_s21, 1024  ;;  %p1805_p6 = scmp.lt.s32.totalorder %s2390_s21, %s2390_s21 }
  0x52   : > { %p1798_p0 = scmp.ne.s32.totalorder %s2390_s21, %s1797_s24  ;;  %p1806_p8 = scmp.lt.s32.totalorder %s1797_s24, %s1797_s24 }
  0x54   : > { %p1800_p2 = pnand %p1798_p0, %p2402_p7  ;;  %p1807_p9 = por %p1806_p8, %p1805_p6 }
  0x56   : > { %p1801_p4 = pneg %p1800_p2 }
  0x58   : > { %p1808_p10 = pnand %p1807_p9, %p1801_p4 }
  0x5a   : > { %1811 = shalt.err (!%p1808_p10)
}
  0x5b   : > { %1610 = dma.hbm_to_vmem [thread:$0]  (!%p2386_p5), %s2932_s5, 1024, %s2390_s21, [#allocation15], %s2209_s13, %s2209_s13, %s2210_s14  }
  0x5c   : > { %s1812_s15 = scalar_lea.hbm %s2883_s7, 16 }
  0x5d   : > { %p1813_p11 = scmp.ne.s32.totalorder %s2883_s7, %s1812_s15  ;;  %p1819_p0 = scmp.lt.u32.totalorder %s1812_s15, %s2883_s7 }
  0x5f   : > { %p1815_p12 = pnand %p1813_p11, %p2402_p7 }
  0x61   : > { %p1816_p13 = pneg %p1815_p12 }
  0x63   : > { %p1821_p2 = pnand %p1819_p0, %p1816_p13 }
  0x65   : > { %1824 = shalt.err (!%p1821_p2)
}
  0x66   : > { %s1825_s24 = scalar_lea.vmem %s528_s17, 16  ;;  %s1832_s21 = scalar_lea.vmem %s528_s17, 32 }
  0x67   : > { %p1826_p4 = scmp.ne.s32.totalorder %s528_s17, %s1825_s24  ;;  %p1833_p9 = scmp.lt.s32.totalorder %s528_s17, %s528_s17 }
  0x68   : > { %p1834_p10 = scmp.lt.s32.totalorder %s1832_s21, %s1825_s24 }
  0x69   : > { %p1828_p6 = pnand %p1826_p4, %p2402_p7 }
  0x6a   : > { %p1835_p3 = por %p1834_p10, %p1833_p9 }
  0x6b   : > { %p1829_p8 = pneg %p1828_p6 }
  0x6d   : > { %p1836_p1 = pnand %p1835_p3, %p1829_p8 }
  0x6f   : > { %1839 = shalt.err (!%p1836_p1)
}
  0x70   : > { %1616 = dma.hbm_to_vmem [thread:$0]  (!%p2386_p5), %s2883_s7, 16, %s528_s17, [#allocation18]  }
  0x71   : > { %s2211_s3 = smov [#allocation13]   ;;  %s2212_s10 = smov [#allocation16]  }
  0x72   : > { %s492_s9 = sshll.u32 %s2211_s3, 4  ;;  %s516_s30 = sshll.u32 %s2212_s10, 4  ;;  %s493_s9 = int_to_ptr.vmem [resolvable:$true] %s492_s9  ;;  %s517_s30 = int_to_ptr.vmem [resolvable:$true] %s516_s30 }
  0x73   : > { %s2933_s4 = sld [smem:[#allocation42_spill]] }
  0x79   : > { %s1840_s26 = scalar_lea.hbm %s2933_s4, 16 }
  0x7a   : > { %p1841_p1 = scmp.ne.s32.totalorder %s2933_s4, %s1840_s26  ;;  %p1847_p12 = scmp.lt.u32.totalorder %s1840_s26, %s2933_s4 }
  0x7c   : > { %p1843_p3 = pnand %p1841_p1, %p2402_p7 }
  0x7e   : > { %p1844_p11 = pneg %p1843_p3 }
  0x80   : > { %p1849_p13 = pnand %p1847_p12, %p1844_p11 }
  0x82   : > { %1852 = shalt.err (!%p1849_p13)
}
  0x83   : > { %s1853_s17 = scalar_lea.vmem %s493_s9, 16  ;;  %s1860_s13 = scalar_lea.vmem %s493_s9, 32 }
  0x84   : > { %p1854_p0 = scmp.ne.s32.totalorder %s493_s9, %s1853_s17  ;;  %p1861_p6 = scmp.lt.s32.totalorder %s493_s9, %s493_s9 }
  0x85   : > { %p1862_p8 = scmp.lt.s32.totalorder %s1860_s13, %s1853_s17 }
  0x86   : > { %p1856_p2 = pnand %p1854_p0, %p2402_p7 }
  0x87   : > { %p1863_p9 = por %p1862_p8, %p1861_p6 }
  0x88   : > { %p1857_p4 = pneg %p1856_p2 }
  0x8a   : > { %p1864_p10 = pnand %p1863_p9, %p1857_p4 }
  0x8c   : > { %1867 = shalt.err (!%p1864_p10)
}
  0x8d   : > { %1607 = dma.hbm_to_vmem [thread:$0]  (!%p2386_p5), %s2933_s4, 16, %s493_s9, [#allocation12]  }
  0x8e   : > { %s1868_s16 = scalar_lea.hbm %s2882_s6, 16 }
  0x8f   : > { %p1869_p1 = scmp.ne.s32.totalorder %s2882_s6, %s1868_s16  ;;  %p1875_p12 = scmp.lt.u32.totalorder %s1868_s16, %s2882_s6 }
  0x91   : > { %p1871_p3 = pnand %p1869_p1, %p2402_p7 }
  0x93   : > { %p1872_p11 = pneg %p1871_p3 }
  0x95   : > { %p1877_p13 = pnand %p1875_p12, %p1872_p11 }
  0x97   : > { %1880 = shalt.err (!%p1877_p13)
}
  0x98   : > { %s1881_s21 = scalar_lea.vmem %s517_s30, 16  ;;  %s1888_s9 = scalar_lea.vmem %s517_s30, 32 }
  0x99   : > { %p1882_p0 = scmp.ne.s32.totalorder %s517_s30, %s1881_s21  ;;  %p1889_p6 = scmp.lt.s32.totalorder %s517_s30, %s517_s30 }
  0x9a   : > { %p1890_p8 = scmp.lt.s32.totalorder %s1888_s9, %s1881_s21 }
  0x9b   : > { %p1884_p2 = pnand %p1882_p0, %p2402_p7 }
  0x9c   : > { %p1891_p9 = por %p1890_p8, %p1889_p6 }
  0x9d   : > { %p1885_p4 = pneg %p1884_p2 }
  0x9f   : > { %p1892_p10 = pnand %p1891_p9, %p1885_p4 }
  0xa1   : > { %1895 = shalt.err (!%p1892_p10)
}
  0xa2   : > { %1613 = dma.hbm_to_vmem [thread:$0]  (!%p2386_p5), %s2882_s6, 16, %s517_s30, [#allocation15]  }
  0xa3   : > { %s2213_s14 = smov [#allocation19]   ;;  %s1896_s16 = scalar_lea.hbm %s2884_s8, 16 }
  0xa4   : > { %s538_s3 = sshll.u32 %s2213_s14, 4  ;;  %p1897_p1 = scmp.ne.s32.totalorder %s2884_s8, %s1896_s16  ;;  %s539_s3 = int_to_ptr.vmem [resolvable:$true] %s538_s3 }
  0xa5   : > { %p1903_p12 = scmp.lt.u32.totalorder %s1896_s16, %s2884_s8 }
  0xa6   : > { %p1899_p3 = pnand %p1897_p1, %p2402_p7 }
  0xa8   : > { %p1900_p11 = pneg %p1899_p3 }
  0xaa   : > { %p1905_p13 = pnand %p1903_p12, %p1900_p11 }
  0xac   : > { %1908 = shalt.err (!%p1905_p13)
}
  0xad   : > { %s1909_s30 = scalar_lea.vmem %s539_s3, 16  ;;  %s1916_s21 = scalar_lea.vmem %s539_s3, 32 }
  0xae   : > { %p1910_p0 = scmp.ne.s32.totalorder %s539_s3, %s1909_s30  ;;  %p1917_p6 = scmp.lt.s32.totalorder %s539_s3, %s539_s3 }
  0xaf   : > { %p1918_p8 = scmp.lt.s32.totalorder %s1916_s21, %s1909_s30 }
  0xb0   : > { %p1912_p2 = pnand %p1910_p0, %p2402_p7 }
  0xb1   : > { %p1919_p9 = por %p1918_p8, %p1917_p6 }
  0xb2   : > { %p1913_p4 = pneg %p1912_p2 }
  0xb4   : > { %p1920_p10 = pnand %p1919_p9, %p1913_p4 }
  0xb6   : > { %1923 = shalt.err (!%p1920_p10)
}
  0xb7   : > { %1619 = dma.hbm_to_vmem [thread:$0]  (!%p2386_p5), %s2884_s8, 16, %s539_s3, [#allocation18]  }
  0xb8   : > { %s48_s11 = sadd.s32 1, %s2196_s19  ;;  %s51_s13 = sadd.s32 1, %s2200_s1 }
  0xb9   : > { %p49_p7 = scmp.ge.s32.totalorder %s48_s11, 3  ;;  %s58_s25 = sadd.s32 1, %s2184_s29 }
  0xba   : > { %p65_p1 = scmp.ne.s32.totalorder %s2184_s29, %s2180_s28  ;;  %p66_p3 = scmp.eq.s32.totalorder %s2204_s20, 0 }
  0xbb   : > { %s2972_s11 = smov (%p49_p7, %s48_s11), 0  ;;  %s2974_s13 = smov (!%p49_p7, %s51_s13), %s2200_s1 }
  0xbc   : > { %s55_s14 = ssub.s32 %s2196_s19, %s2972_s11  ;;  %p2530_p11 = por %p66_p3, %p65_p1 }
  0xbd   : > { %p53_p5 = scmp.ge.s32.totalorder %s2974_s13, 3  ;;  %p56_p12 = scmp.eq.s32.totalorder %s55_s14, 0 }
  0xbe   : > { %p71_p13 = scmp.ne.s32.totalorder %s2180_s28, %s2176_s27  ;;  %p1630_p0 = scmp.lt.s32.totalorder %s2204_s20, 9 }
  0xbf   : > { %s2976_s13 = smov (%p53_p5, %s2974_s13), 0  ;;  %p2935_p2 = scmp.ne.s32.totalorder %s2927_s22, 0 }
  0xc0   : > { %s2540_s3 = scalar_select %p56_p12, %s2184_s29, %s58_s25  }
  0xc1   : > { %p2544_p4 = por %p2935_p2, %p71_p13  ;;  %s561_s16 = sand.u32 1, %s2184_s29  }
  0xc2   : > { %s1419_s26 = sshll.u32 %s561_s16, 3  ;;  %s1420_s18 = sshll.u32 %s2196_s19, 7 }
  0xc3   : > { %s2937_s30 = sld [smem:[#allocation38_spill]]  ;;  %s565_s27 = scalar_lea.vmem [#allocation8], %s1419_s26 }
  0xc4   : > { %s572_s17 = sshll.u32 %s565_s27, 4  ;;  %p2559_p6 = pnand %p1630_p0, %p2530_p11  ;;  %s2555_s17 = int_to_ptr.vmem [resolvable:$true] %s572_s17 }
  0xc5   : > { %s562_s14 = scalar_lea.sflag [#allocation9], %s561_s16 }
  0xc6   : > { %p1926_p9 = pneg %p2559_p6 }
  0xc9   : > { %s2938_s21 = smov %s2937_s30  ;;  %s2553_s9 = scalar_lea.hbm %s2937_s30, %s1420_s18 }
  0xca   : > { %s1924_s4 = scalar_lea.hbm %s2553_s9, 128  ;;  %s1929_s12 = scalar_lea.hbm %s2938_s21, 384 }
  0xcb   : > { %p1925_p8 = scmp.ne.s32.totalorder %s2553_s9, %s1924_s4  ;;  %p1930_p1 = scmp.lt.u32.totalorder %s2553_s9, %s2938_s21 }
  0xcc   : > { %p1931_p3 = scmp.lt.u32.totalorder %s1929_s12, %s1924_s4  ;;  %p1933_p5 = scmp.lt.u32.totalorder %s1924_s4, %s2553_s9 }
  0xcd   : > { %p1927_p10 = pnand %p1926_p9, %p1925_p8 }
  0xce   : > { %p1932_p11 = por %p1931_p3, %p1930_p1 }
  0xcf   : > { %p1928_p7 = pneg %p1927_p10 }
  0xd0   : > { %p1934_p12 = por %p1933_p5, %p1932_p11 }
  0xd2   : > { %p1935_p13 = pnand %p1934_p12, %p1928_p7 }
  0xd4   : > { %1938 = shalt.err (!%p1935_p13)
}
  0xd5   : > { %s1939_s16 = scalar_lea.vmem %s2555_s17, 128  ;;  %s2214_s30 = smov [#allocation8]  }
  0xd6   : > { %p1940_p0 = scmp.ne.s32.totalorder %s2555_s17, %s1939_s16  ;;  %s1944_s27 = sshll.u32 %s2214_s30, 4  ;;  %s1945_s27 = int_to_ptr.vmem [resolvable:$false] %s1944_s27 }
  0xd7   : > { %s1946_s26 = scalar_lea.vmem %s1945_s27, 256  ;;  %p1947_p10 = scmp.lt.s32.totalorder %s2555_s17, %s1945_s27 }
  0xd8   : > { %p1942_p2 = pnand %p1940_p0, %p1926_p9  ;;  %p1948_p1 = scmp.lt.s32.totalorder %s1946_s26, %s1939_s16 }
  0xda   : > { %p1943_p8 = pneg %p1942_p2  ;;  %p1949_p3 = por %p1948_p1, %p1947_p10 }
  0xdc   : > { %p1950_p11 = pnand %p1949_p3, %p1943_p8 }
  0xde   : > { %1953 = shalt.err (!%p1950_p11)
}
  0xdf   : > { %1623 = dma.hbm_to_vmem [thread:$0]  (!%p2559_p6), %s2553_s9, 128, %s2555_s17, %s562_s14  }
  0xe0   : > { %p2940_p7 = scmp.ne.s32.totalorder %s2928_s2, 0 }
  0xe1   : > { %s583_s4 = sand.u32 (!%p2940_p7), 1, %s2180_s28  }
  0xe2   : > { %581 = sbr.rel (%p2940_p7) target bundleno = 1451 (0x5ab), region = 72  ;;  %s2591_s18 = sshll.u32 (!%p2940_p7), %s583_s4, 3 }
  0xe3   : > { %s584_s12 = scalar_lea.sflag (!%p2940_p7), [#allocation9], %s583_s4  ;;  %s587_s10 = scalar_lea.vmem (!%p2940_p7), [#allocation8], %s2591_s18 }
  0xe9   : > { %2143 = dma.done.wait (%p2544_p4), %s584_s12, 128  }
  0xea   : > { %2145 = vsyncadd (%p2544_p4), %s584_s12, 4294967168  ;;  %p2941_p9 = scmp.ne.s32.totalorder %s2927_s22, 0 }
  0xec   : > { %2147 = dma.done.wait (%p2941_p9), [#allocation12], 528  }
  0xed   : > { %2149 = vsyncadd (%p2941_p9), [#allocation12], 4294966768 }
  0xee   : > { %2151 = dma.done.wait (%p2941_p9), [#allocation15], 1040  }
  0xef   : > { %2153 = vsyncadd (%p2941_p9), [#allocation15], 4294966256 }
  0xf0   : > { %2155 = dma.done.wait (%p2941_p9), [#allocation18], 32  }
  0xf1   : > { %2157 = vsyncadd (%p2941_p9), [#allocation18], 4294967264  ;;  %s2942_s2 = sld [smem:[#allocation37_spill]]  ;;  %p659_p4 = scmp.eq.s32.totalorder %s2192_s0, 0 }
  0xf7   : > { %p660_p6 = scmp.eq.s32.totalorder %s2942_s2, 0 }
  0xf9   : > { %p661_p5 = pnand %p660_p6, %p659_p4 }
  0xfa   : > { %vm665_vm0 = vcmask (!%p661_p5), 516096   ;;  %vm668_vm1 = vcmask (!%p661_p5), 253952   ;;  %v2215_v0 = vmov (!%p661_p5), 0.0  }
  0xfb   : > { %664 = sbr.rel (%p661_p5) target bundleno = 258 (0x102), region = 104  ;;  %666 = vst.msk [vmem:[#allocation2] sm:$0x1] (!%p661_p5), %vm665_vm0, %v2215_v0  ;;  %667 = vst.msk [vmem:[#allocation3] sm:$0x1] (!%p661_p5), %vm665_vm0, %v2215_v0 }
  0xfc   : > { %669 = vst.msk [vmem:[#allocation4] sm:$0x1] (!%p661_p5), %vm668_vm1, %v2215_v0  ;;  %670 = vst.msk [vmem:[#allocation5] sm:$0x1] (!%p661_p5), %vm668_vm1, %v2215_v0 }
  0xfd   : > { %671 = vst.msk [vmem:[#allocation6] sm:$0x1] (!%p661_p5), %vm668_vm1, %v2215_v0  ;;  %672 = vst.msk [vmem:[#allocation7] sm:$0x1] (!%p661_p5), %vm668_vm1, %v2215_v0 }
 0x102 PF: > { %v687_v1 = vld [vmem:[#allocation11] sm:$0xff]  ;;  %s2943_s22 = sld [smem:[#allocation37_spill]]  ;;  %v688_v2 = vld [vmem:[#allocation11 + $0x8] sm:$0xff]  ;;  %v689_v3 = vld [vmem:[#allocation11 + $0x10] sm:$0xff]  ;;  %v674_v4 = vlaneseq  ;;  %v2216_v5 = vmov 0.0|0.0   ;;  %vm2217_vm2 = vmmov 0  }
 0x103   : > { %1521 = vmatprep.subr.bf16.mxu0 %v2216_v5  ;;  %v1522_v6 = vpack.c.bf16 %v688_v2, %v687_v1  ;;  %v690_v7 = vld [vmem:[#allocation11 + $0x18] sm:$0xff]  ;;  %v2218_v10 = vmov 0.0   ;;  %vm698_vm4 = vcmask 261120   ;;  %s2944_s16 = sld [smem:[#allocation40_spill]]  ;;  %p1433_p13 = scmp.ne.s32.totalorder %s2192_s0, 0 }
 0x104   : > { %v675_v9 = vshrl.u32 %v674_v4, 7  ;;  %1488 = vmatprep.mubr.msk.f32.mxu0 %vm2217_vm2, %v2218_v10  ;;  %v1525_v11 = vpack.c.bf16 %v690_v7, %v689_v3  ;;  %v686_v14 = vld [vmem:[%s587_s10] sm:$0xff]  ;;  %vm777_vm5 = vcmask (!%p1433_p13), 523264   ;;  %v803_v41 = vld [vmem:[#allocation2] sm:$0x1] (!%p1433_p13)  ;;  %vm808_vm6 = vcmask (!%p1433_p13), 516096  }
 0x105   : > { %1523 = vmatpush3.bf16.msra.mxu0 %v1522_v6  ;;  %v810_v45 = vld [vmem:[#allocation3] sm:$0x1] (!%p1433_p13) }
 0x106   : > { %1524 = vmatprep.subr.bf16.mxu0 %v2216_v5 }
 0x108   : > { %s1429_s15 = sshll.u32 %s2943_s22, 3 }
 0x109   : > { %v676_v8 = vstv %s1429_s15  ;;  %s681_s9 = ssub.s32 24, %s1429_s15  ;;  %s2615_s17 = scvt.s32.f32 %s1429_s15  ;;  %1526 = vmatpush3.bf16.msra.mxu0 %v1525_v11  ;;  %v1431_v15 = vld [vmem:[%s2944_s16] ss:$0 sm:$0xff] }
 0x10a   : > { %p682_p12 = scmp.lt.s32.totalorder %s681_s9, 8  ;;  %v677_v12 = vadd.s32 %v676_v8, %v675_v9 }
 0x10c   : > { %s2978_s9 = smov (!%p682_p12, %s681_s9), 8  ;;  %vm678_vm3 = vcmp.lt.s32.totalorder %v677_v12, 24  ;;  %1489 = vmatmul.mubr.msk.f32.vlgmr.msra.gmra.mrb[0].mxu0 %vm698_vm4, %v686_v14 }
 0x10d   : > { %s2617_s25 = scvt.s32.f32 %s2978_s9  ;;  %v2619_v13 = vsel %vm678_vm3, 1.0, %v2218_v10 }
 0x10f   : > { %s798_s30 = sadd.f32 (!%p1433_p13), %s2615_s17, %s2617_s25  ;;  %v785_v26 = vstv (!%p1433_p13), %s2617_s25 }
 0x111   : > { %v799_v21 = vstv (!%p1433_p13), %s798_s30 }
 0x112   : > { %1738 = vrcp.f32 (!%p1433_p13), %v799_v21 }
 0x113   : > { %1740 = vrcp.f32 (!%p1433_p13), %v785_v26 }
 0x11c   : > { %v1739_v28 = vpop.eup (!%p1433_p13), %1738 }
 0x11d   : > { %1545 = vpush (!%p1433_p13), %v1739_v28  ;;  %v1741_v31 = vpop.eup (!%p1433_p13), %1740 }
 0x14e   : > { %s1546_s27 = spop (!%p1433_p13), %1545 }
 0x14f   : > { %s802_s26 = smul.f32 (!%p1433_p13), %s1546_s27, %s2617_s25 }
 0x151   : > { %v805_v47 = vstv (!%p1433_p13), %s802_s26  ;;  %s813_s4 = smul.f32 (!%p1433_p13), %s802_s26, %s2615_s17 }
 0x153   : > { %v814_v50 = vstv (!%p1433_p13), %s813_s4 }
 0x1dc   : > { %775 = sbr.rel (%p1433_p13) target bundleno = 525 (0x20d), region = 108 }
 0x1df   : > { %v768_v16 = vpop.f32.mrb[0].mxu0 }
 0x1e0   : > { %v769_v17 = vadd.f32 %v1431_v15, %v768_v16  ;;  %v1490_v18 = vpop.f32.mrb[1].mxu0 }
 0x1e2   : > { %v2627_v19 = vmax.f32 %v769_v17, 0.0 }
 0x1e4   : > { %v776_v20 = vmul.f32 %v2619_v13, %v2627_v19 }
 0x1e6   : > { %v778_v22 = vsel %vm777_vm5, %v776_v20, 0.0 }
 0x1e7   : > { %v779_v23 = vrot.slane %v778_v22, 4 }
 0x1e9   : > { %v780_v24 = vadd.f32 %v779_v23, %v778_v22 }
 0x1eb   : > { %v781_v25 = vrot.slane %v780_v24, 2 }
 0x1ed   : > { %v782_v27 = vadd.f32 %v781_v25, %v780_v24 }
 0x1ef   : > { %v783_v29 = vrot.slane %v782_v27, 1 }
 0x1f1   : > { %v784_v30 = vadd.f32 %v783_v29, %v782_v27 }
 0x1f3   : > { %v787_v32 = vmul.f32 %v1741_v31, %v784_v30 }
 0x1f5   : > { %v788_v33 = vsub.f32 %v2627_v19, %v787_v32  ;;  %v804_v43 = vsub.f32 %v787_v32, %v803_v41 }
 0x1f7   : > { %v789_v34 = vmul.f32 %v2619_v13, %v788_v33  ;;  %v812_v46 = vmul.f32 %v804_v43, %v804_v43  ;;  %v806_v48 = vmul.f32 %v805_v47, %v804_v43 }
 0x1f9   : > { %v790_v35 = vmul.f32 %v789_v34, %v789_v34  ;;  %v807_v51 = vadd.f32 %v806_v48, %v803_v41  ;;  %v815_v52 = vmul.f32 %v814_v50, %v812_v46 }
 0x1fb   : > { %v791_v36 = vsel %vm777_vm5, %v790_v35, 0.0  ;;  %809 = vst.msk [vmem:[#allocation2] sm:$0x1] %vm808_vm6, %v807_v51 }
 0x1fc   : > { %v792_v37 = vrot.slane %v791_v36, 4 }
 0x1fe   : > { %v793_v38 = vadd.f32 %v792_v37, %v791_v36 }
 0x200   : > { %v794_v39 = vrot.slane %v793_v38, 2 }
 0x202   : > { %v795_v40 = vadd.f32 %v794_v39, %v793_v38 }
 0x204   : > { %v796_v42 = vrot.slane %v795_v40, 1 }
 0x206   : > { %v797_v44 = vadd.f32 %v796_v42, %v795_v40 }
 0x208   : > { %v811_v49 = vadd.f32 %v810_v45, %v797_v44 }
 0x20a   : > { %v816_v53 = vadd.f32 %v815_v52, %v811_v49 }
 0x20c   : > { %817 = vst.msk [vmem:[#allocation3] sm:$0x1] %vm808_vm6, %v816_v53 }
 0x20d PF: > { %p1434_p0 = scmp.lt.s32.totalorder %s2192_s0, 1 }
 0x20e   : > { %p822_p2 = scmp.eq.s32.totalorder (!%p1434_p0), %s2192_s0, 1 }
 0x20f   : > { %821 = sbr.rel (%p1434_p0) target bundleno = 1275 (0x4fb), region = 112 }
 0x210   : > { %p823_p8 = pnand (!%p1434_p0), %p822_p2, %p660_p6 }
 0x216   : > { %826 = sbr.rel (%p823_p8) target bundleno = 559 (0x22f), region = 116  ;;  %v828_v54 = vld [vmem:[#allocation3] sm:$0x1] (!%p823_p8)  ;;  %s2946_s2 = sld [smem:[#allocation41_spill]] (!%p823_p8)  ;;  %vm835_vm7 = vcmask (!%p823_p8), 516096  }
 0x217   : > { %v829_v55 = vmul.f32 (!%p823_p8), 0.041666668, %v828_v54  ;;  %v827_v60 = vld [vmem:[#allocation2] sm:$0x1] (!%p823_p8)  ;;  %v837_v62 = vld [vmem:[#allocation13] sm:$0x1] (!%p823_p8) }
 0x219   : > { %v830_v56 = vmax.f32 (!%p823_p8), %v829_v55, 0.0 }
 0x21b   : > { %v832_v57 = vadd.f32 (!%p823_p8), 1e-05, %v830_v56 }
 0x21c   : > { %v831_v58 = vld [vmem:[%s2946_s2] sm:$0x1] (!%p823_p8) }
 0x21d   : > { %1742 = vrsqrt.f32 %v832_v57 }
 0x227   : > { %v1743_v59 = vpop.eup %1742 }
 0x228   : > { %v834_v61 = vmul.f32 %v1743_v59, %v831_v58 }
 0x22a   : > { %836 = vst.msk [vmem:[#allocation20] sm:$0x1] %vm835_vm7, %v834_v61  ;;  %v838_v63 = vmul.f32 %v834_v61, %v827_v60 }
 0x22c   : > { %v839_v0 = vsub.f32 %v837_v62, %v838_v63 }
 0x22e   : > { %840 = vst.msk [vmem:[#allocation21] sm:$0x1] %vm835_vm7, %v839_v0 }
 0x22f PF: > { %v857_v1 = vld [vmem:[#allocation14] sm:$0xff]  ;;  %v858_v2 = vld [vmem:[#allocation14 + $0x8] sm:$0xff]  ;;  %v859_v3 = vld [vmem:[#allocation14 + $0x10] sm:$0xff]  ;;  %v2219_v4 = vmov 0.0|0.0   ;;  %vm2220_vm8 = vmmov 0   ;;  %v2221_v7 = vmov 0.0  }
 0x230   : > { %1527 = vmatprep.subr.bf16.mxu0 %v2219_v4  ;;  %v1528_v5 = vpack.c.bf16 %v858_v2, %v857_v1  ;;  %v860_v6 = vld [vmem:[#allocation14 + $0x18] sm:$0xff]  ;;  %1507 = vmatprep.mubr.msk.f32.mxu0 %vm2220_vm8, %v2221_v7  ;;  %v861_v9 = vld [vmem:[#allocation14 + $0x20] sm:$0xff]  ;;  %v862_v10 = vld [vmem:[#allocation14 + $0x28] sm:$0xff]  ;;  %vm872_vm9 = vcmask 523264   ;;  %p1439_p10 = scmp.ne.s32.totalorder %s2192_s0, 1 }
 0x231   : > { %v1531_v8 = vpack.c.bf16 %v860_v6, %v859_v3  ;;  %v1534_v11 = vpack.c.bf16 %v862_v10, %v861_v9  ;;  %v1435_v12 = vld [vmem:[#allocation20] ss:$0 sm:$0xff]  ;;  %v863_v14 = vld [vmem:[#allocation14 + $0x30] sm:$0xff]  ;;  %v864_v15 = vld [vmem:[#allocation14 + $0x38] sm:$0xff]  ;;  %s971_s22 = sadd.f32 (!%p1439_p10), %s2615_s17, %s2617_s25  ;;  %v958_v31 = vstv (!%p1439_p10), %s2617_s25  ;;  %vm981_vm10 = vcmask (!%p1439_p10), 253952  }
 0x232   : > { %1529 = vmatpush3.bf16.msra.mxu0 %v1528_v5  ;;  %v848_v16 = vmul.f32 %v1435_v12, %v2627_v19  ;;  %v1537_v17 = vpack.c.bf16 %v864_v15, %v863_v14  ;;  %v1437_v21 = vld [vmem:[#allocation16] ss:$0 sm:$0xff]  ;;  %v976_v46 = vld [vmem:[#allocation4] sm:$0x1] (!%p1439_p10)  ;;  %v983_v50 = vld [vmem:[#allocation5] sm:$0x1] (!%p1439_p10) }
 0x233   : > { %1530 = vmatprep.subr.bf16.mxu0 %v2219_v4  ;;  %v972_v26 = vstv (!%p1439_p10), %s971_s22 }
 0x234   : > { %1744 = vrcp.f32 (!%p1439_p10), %v972_v26 }
 0x235   : > { %v1436_v18 = vld [vmem:[#allocation21] ss:$0 sm:$0xff]  ;;  %1746 = vrcp.f32 (!%p1439_p10), %v958_v31 }
 0x236   : > { %1532 = vmatpush3.bf16.msra.mxu0 %v1531_v8  ;;  %v856_v20 = vadd.f32 %v1436_v18, %v848_v16 }
 0x237   : > { %1533 = vmatprep.subr.bf16.mxu0 %v2219_v4 }
 0x23a   : > { %1535 = vmatpush3.bf16.msra.mxu0 %v1534_v11 }
 0x23b   : > { %1536 = vmatprep.subr.bf16.mxu0 %v2219_v4 }
 0x23e   : > { %1538 = vmatpush3.bf16.msra.mxu0 %v1537_v17  ;;  %v1745_v33 = vpop.eup (!%p1439_p10), %1744 }
 0x23f   : > { %1547 = vpush (!%p1439_p10), %v1745_v33  ;;  %v1747_v36 = vpop.eup (!%p1439_p10), %1746 }
 0x241   : > { %1508 = vmatmul.mubr.msk.f32.vlgmr.msra.gmra.mrb[0].mxu0 %vm872_vm9, %v856_v20 }
 0x270   : > { %s1548_s15 = spop (!%p1439_p10), %1547 }
 0x271   : > { %s975_s9 = smul.f32 (!%p1439_p10), %s1548_s15, %s2617_s25 }
 0x273   : > { %v978_v52 = vstv (!%p1439_p10), %s975_s9  ;;  %s986_s14 = smul.f32 (!%p1439_p10), %s975_s9, %s2615_s17 }
 0x275   : > { %v987_v55 = vstv (!%p1439_p10), %s986_s14 }
 0x311   : > { %949 = sbr.rel (%p1439_p10) target bundleno = 834 (0x342), region = 120 }
 0x314   : > { %v942_v22 = vpop.f32.mrb[0].mxu0 }
 0x315   : > { %v2649_v23 = vadd.f32 %v1437_v21, %v942_v22  ;;  %v1509_v24 = vpop.f32.mrb[1].mxu0 }
 0x317   : > { %v2652_v25 = vmax.f32 %v2649_v23, 0.0 }
 0x319   : > { %v950_v19 = vmul.f32 %v2619_v13, %v2652_v25 }
 0x31b   : > { %v951_v27 = vsel %vm698_vm4, %v950_v19, 0.0 }
 0x31c   : > { %v952_v28 = vrot.slane %v951_v27, 4 }
 0x31e   : > { %v953_v29 = vadd.f32 %v952_v28, %v951_v27 }
 0x320   : > { %v954_v30 = vrot.slane %v953_v29, 2 }
 0x322   : > { %v955_v32 = vadd.f32 %v954_v30, %v953_v29 }
 0x324   : > { %v956_v34 = vrot.slane %v955_v32, 1 }
 0x326   : > { %v957_v35 = vadd.f32 %v956_v34, %v955_v32 }
 0x328   : > { %v960_v37 = vmul.f32 %v1747_v36, %v957_v35 }
 0x32a   : > { %v961_v38 = vsub.f32 %v2652_v25, %v960_v37  ;;  %v977_v48 = vsub.f32 %v960_v37, %v976_v46 }
 0x32c   : > { %v962_v39 = vmul.f32 %v2619_v13, %v961_v38  ;;  %v985_v51 = vmul.f32 %v977_v48, %v977_v48  ;;  %v979_v53 = vmul.f32 %v978_v52, %v977_v48 }
 0x32e   : > { %v963_v40 = vmul.f32 %v962_v39, %v962_v39  ;;  %v980_v56 = vadd.f32 %v979_v53, %v976_v46  ;;  %v988_v57 = vmul.f32 %v987_v55, %v985_v51 }
 0x330   : > { %v964_v41 = vsel %vm698_vm4, %v963_v40, 0.0  ;;  %982 = vst.msk [vmem:[#allocation4] sm:$0x1] %vm981_vm10, %v980_v56 }
 0x331   : > { %v965_v42 = vrot.slane %v964_v41, 4 }
 0x333   : > { %v966_v43 = vadd.f32 %v965_v42, %v964_v41 }
 0x335   : > { %v967_v44 = vrot.slane %v966_v43, 2 }
 0x337   : > { %v968_v45 = vadd.f32 %v967_v44, %v966_v43 }
 0x339   : > { %v969_v47 = vrot.slane %v968_v45, 1 }
 0x33b   : > { %v970_v49 = vadd.f32 %v969_v47, %v968_v45 }
 0x33d   : > { %v984_v54 = vadd.f32 %v983_v50, %v970_v49 }
 0x33f   : > { %v989_v58 = vadd.f32 %v988_v57, %v984_v54 }
 0x341   : > { %990 = vst.msk [vmem:[#allocation5] sm:$0x1] %vm981_vm10, %v989_v58 }
 0x342 PF: > { %p1440_p1 = scmp.ne.s32.totalorder %s2192_s0, 2 }
 0x343   : > { %s2947_s24 = sld [smem:[#allocation37_spill]] (!%p1440_p1) }
 0x344   : > { %994 = sbr.rel (%p1440_p1) target bundleno = 1275 (0x4fb), region = 124 }
 0x349   : > { %p1441_p3 = scmp.ne.s32.totalorder (!%p1440_p1), %s2947_s24, 0 }
 0x34b   : > { %997 = sbr.rel (%p1441_p3) target bundleno = 868 (0x364), region = 128  ;;  %v999_v59 = vld [vmem:[#allocation5] sm:$0x1] (!%p1441_p3)  ;;  %v1002_v63 = vld [vmem:[#allocation17] sm:$0x1] (!%p1441_p3)  ;;  %vm1006_vm11 = vcmask (!%p1441_p3), 253952  }
 0x34c   : > { %v1000_v60 = vmul.f32 (!%p1441_p3), 0.041666668, %v999_v59  ;;  %v998_v1 = vld [vmem:[#allocation4] sm:$0x1] (!%p1441_p3)  ;;  %v1008_v3 = vld [vmem:[#allocation19] sm:$0x1] (!%p1441_p3) }
 0x34e   : > { %v1001_v61 = vmax.f32 (!%p1441_p3), %v1000_v60, 0.0 }
 0x350   : > { %v1003_v62 = vadd.f32 (!%p1441_p3), 1e-05, %v1001_v61 }
 0x352   : > { %1748 = vrsqrt.f32 %v1003_v62 }
 0x35c   : > { %v1749_v0 = vpop.eup %1748 }
 0x35d   : > { %v1005_v2 = vmul.f32 %v1749_v0, %v1002_v63 }
 0x35f   : > { %1007 = vst.msk [vmem:[#allocation23] sm:$0x1] %vm1006_vm11, %v1005_v2  ;;  %v1009_v4 = vmul.f32 %v1005_v2, %v998_v1 }
 0x361   : > { %v1010_v5 = vsub.f32 %v1008_v3, %v1009_v4 }
 0x363   : > { %1011 = vst.msk [vmem:[#allocation24] sm:$0x1] %vm1006_vm11, %v1010_v5 }
 0x364 PF: > { %s2948_s30 = sld [smem:[#allocation44_spill]]  ;;  %s1139_s18 = sadd.f32 %s2615_s17, %s2617_s25  ;;  %v2223_v8 = vmov 0.0|0.0   ;;  %vm2224_vm12 = vmmov 0   ;;  %v2225_v12 = vmov 0.0   ;;  %v1126_v29 = vstv %s2617_s25  ;;  %v1144_v38 = vld [vmem:[#allocation6] sm:$0x1] }
 0x365   : > { %s2222_s12 = smov 96   ;;  %1539 = vmatprep.subr.bf16.mxu0 %v2223_v8  ;;  %1518 = vmatprep.mubr.msk.f32.mxu0 %vm2224_vm12, %v2225_v12  ;;  %s2950_s24 = sld [smem:[#allocation45_spill]]  ;;  %vm1149_vm13 = vcmask 253952   ;;  %v1151_v54 = vld [vmem:[#allocation7] sm:$0x1] }
 0x366   : > { %1029 = vrot.lane.b32.xlu0 %v2649_v23, %s2222_s12  ;;  %v1140_v14 = vstv %s1139_s18  ;;  %v1442_v17 = vld [vmem:[#allocation23] ss:$0 sm:$0xff] }
 0x367   : > { %1750 = vrcp.f32 %v1140_v14  ;;  %v1019_v18 = vmul.f32 %v1442_v17, %v2652_v25 }
 0x368   : > { %1752 = vrcp.f32 %v1126_v29 }
 0x36a   : > { %s2949_s26 = smov %s2948_s30  ;;  %v1033_v6 = vld [vmem:[%s2948_s30] sm:$0xff]  ;;  %s2951_s30 = sld [smem:[#allocation37_spill]] }
 0x36b   : > { %v1034_v7 = vld [vmem:[%s2949_s26 + $0x8] sm:$0xff]  ;;  %v1035_v10 = vld [vmem:[%s2949_s26 + $0x10] sm:$0xff]  ;;  %v1036_v11 = vld [vmem:[%s2949_s26 + $0x18] sm:$0xff] }
 0x36c   : > { %v1540_v9 = vpack.c.bf16 %v1034_v7, %v1033_v6  ;;  %v1543_v15 = vpack.c.bf16 %v1036_v11, %v1035_v10  ;;  %v1443_v20 = vld [vmem:[#allocation24] ss:$0 sm:$0xff]  ;;  %v1444_v24 = vld [vmem:[%s2950_s24] ss:$0 sm:$0xff] }
 0x36d   : > { %v1027_v21 = vadd.f32 %v1443_v20, %v1019_v18 }
 0x36e   : > { %1541 = vmatpush3.bf16.msra.mxu0 %v1540_v9 }
 0x36f   : > { %1542 = vmatprep.subr.bf16.mxu0 %v2223_v8 }
 0x370   : > { %p1446_p11 = scmp.ne.s32.totalorder %s2951_s30, 2 }
 0x371   : > { %v1751_v16 = vpop.eup %1750  ;;  %s2952_s4 = sld [smem:[#allocation46_spill]] (!%p1446_p11)  ;;  %s2953_s10 = sld [smem:[#allocation47_spill]] (!%p1446_p11) }
 0x372   : > { %1544 = vmatpush3.bf16.msra.mxu0 %v1543_v15  ;;  %1549 = vpush %v1751_v16  ;;  %v1753_v36 = vpop.eup %1752 }
 0x377   : > { %v1167_v63 = vld [vmem:[%s2952_s4] sm:$0x1] (!%p1446_p11) }
 0x378   : > { %v1172_v3 = vld [vmem:[%s2953_s10] sm:$0x1] (!%p1446_p11) }
 0x3a3   : > { %s1550_s0 = spop %1549 }
 0x3a4   : > { %s1143_s16 = smul.f32 %s1550_s0, %s2617_s25 }
 0x3a6   : > { %v1146_v40 = vstv %s1143_s16  ;;  %s1154_s25 = smul.f32 %s1143_s16, %s2615_s17 }
 0x3a8   : > { %v1155_v55 = vstv %s1154_s25 }
 0x3d8   : > { %v1030_v22 = vpop.permute.xlu0 %1029 }
 0x3d9   : > { %v1032_v23 = vadd.f32 %v1030_v22, %v1027_v21 }
 0x3db   : > { %1519 = vmatmul.mubr.msk.f32.vlgmr.msra.gmra.mrb[0].mxu0 %vm698_vm4, %v1032_v23 }
 0x4ae   : > { %v1113_v19 = vpop.f32.mrb[0].mxu0 }
 0x4af   : > { %v1114_v26 = vadd.f32 %v1444_v24, %v1113_v19  ;;  %v1520_v27 = vpop.f32.mrb[1].mxu0 }
 0x4b1   : > { %v1117_v28 = vmax.f32 %v1114_v26, 0.0 }
 0x4b3   : > { %v1118_v30 = vmul.f32 %v2619_v13, %v1117_v28 }
 0x4b5   : > { %v1119_v25 = vsel %vm698_vm4, %v1118_v30, 0.0 }
 0x4b6   : > { %v1120_v31 = vrot.slane %v1119_v25, 4 }
 0x4b8   : > { %v1121_v32 = vadd.f32 %v1120_v31, %v1119_v25 }
 0x4ba   : > { %v1122_v33 = vrot.slane %v1121_v32, 2 }
 0x4bc   : > { %v1123_v34 = vadd.f32 %v1122_v33, %v1121_v32 }
 0x4be   : > { %v1124_v35 = vrot.slane %v1123_v34, 1 }
 0x4c0   : > { %v1125_v37 = vadd.f32 %v1124_v35, %v1123_v34 }
 0x4c2   : > { %v1128_v39 = vmul.f32 %v1753_v36, %v1125_v37 }
 0x4c4   : > { %v1129_v41 = vsub.f32 %v1117_v28, %v1128_v39  ;;  %v1145_v42 = vsub.f32 %v1128_v39, %v1144_v38 }
 0x4c6   : > { %v1130_v43 = vmul.f32 %v2619_v13, %v1129_v41  ;;  %v1147_v44 = vmul.f32 %v1146_v40, %v1145_v42  ;;  %v1153_v53 = vmul.f32 %v1145_v42, %v1145_v42 }
 0x4c8   : > { %v1131_v45 = vmul.f32 %v1130_v43, %v1130_v43  ;;  %v1148_v46 = vadd.f32 %v1147_v44, %v1144_v38  ;;  %v1156_v13 = vmul.f32 %v1155_v55, %v1153_v53 }
 0x4ca   : > { %v1132_v47 = vsel %vm698_vm4, %v1131_v45, 0.0  ;;  %1150 = vst.msk [vmem:[#allocation6] sm:$0x1] %vm1149_vm13, %v1148_v46 }
 0x4cb   : > { %v1133_v48 = vrot.slane %v1132_v47, 4 }
 0x4cd   : > { %v1134_v49 = vadd.f32 %v1133_v48, %v1132_v47 }
 0x4cf   : > { %v1135_v50 = vrot.slane %v1134_v49, 2 }
 0x4d1   : > { %v1136_v51 = vadd.f32 %v1135_v50, %v1134_v49  ;;  %v1163_v1 = vld [vmem:[#allocation6] sm:$0x1] (!%p1446_p11) }
 0x4d3   : > { %v1137_v52 = vrot.slane %v1136_v51, 1 }
 0x4d5   : > { %v1138_v56 = vadd.f32 %v1137_v52, %v1136_v51  ;;  %1162 = sbr.rel (%p1446_p11) target bundleno = 1275 (0x4fb), region = 132 }
 0x4d7   : > { %v1152_v57 = vadd.f32 %v1151_v54, %v1138_v56 }
 0x4d9   : > { %v1157_v58 = vadd.f32 %v1156_v13, %v1152_v57 }
 0x4db   : > { %1158 = vst.msk [vmem:[#allocation7] sm:$0x1] %vm1149_vm13, %v1157_v58 }
 0x4e2   : > { %v1164_v59 = vld [vmem:[#allocation7] sm:$0x1] }
 0x4e3   : > { %v1165_v60 = vmul.f32 0.041666668, %v1164_v59 }
 0x4e5   : > { %v1166_v61 = vmax.f32 %v1165_v60, 0.0 }
 0x4e7   : > { %v1168_v62 = vadd.f32 1e-05, %v1166_v61 }
 0x4e9   : > { %1754 = vrsqrt.f32 %v1168_v62 }
 0x4f3   : > { %v1755_v0 = vpop.eup %1754 }
 0x4f4   : > { %v1170_v2 = vmul.f32 %v1755_v0, %v1167_v63 }
 0x4f6   : > { %1171 = vst.msk [vmem:[#allocation26] sm:$0x1] %vm1149_vm13, %v1170_v2  ;;  %v1173_v4 = vmul.f32 %v1170_v2, %v1163_v1 }
 0x4f8   : > { %v1174_v5 = vsub.f32 %v1172_v3, %v1173_v4 }
 0x4fa   : > { %1175 = vst.msk [vmem:[#allocation27] sm:$0x1] %vm1149_vm13, %v1174_v5 }
 0x4fb PF: > { %s2954_s2 = sadd.s32 4294967295, %s2204_s20   ;;  %s2226_s15 = smov [#allocation21]  }
 0x4fc   : > { %p2708_p7 = scmp.eq.s32.totalorder %s2954_s2, 8  ;;  %s1194_s9 = sshll.u32 %s2226_s15, 4  ;;  %s1195_s9 = int_to_ptr.vmem [resolvable:$true] %s1194_s9 }
 0x4fd   : > { %s2227_s14 = smov [#allocation24]   ;;  %s1954_s0 = scalar_lea.vmem %s1195_s9, 16 }
 0x4fe   : > { %s1216_s24 = sshll.u32 %s2227_s14, 4  ;;  %p1955_p9 = scmp.ne.s32.totalorder %s1195_s9, %s1954_s0  ;;  %s1217_s24 = int_to_ptr.vmem [resolvable:$true] %s1216_s24 }
 0x4ff   : > { %s1960_s16 = scalar_lea.vmem %s1195_s9, 32  ;;  %p1961_p5 = scmp.lt.s32.totalorder %s1195_s9, %s1195_s9 }
 0x500   : > { %p1956_p4 = pnand %p1955_p9, %p2708_p7  ;;  %p1962_p12 = scmp.lt.s32.totalorder %s1960_s16, %s1954_s0 }
 0x502   : > { %p1957_p6 = pneg %p1956_p4  ;;  %p1963_p13 = por %p1962_p12, %p1961_p5 }
 0x504   : > { %p1964_p0 = pnand %p1963_p13, %p1957_p6 }
 0x506   : > { %1967 = shalt.err (!%p1964_p0)
}
 0x507   : > { %s2956_s17 = sld [smem:[#allocation49_spill]] }
 0x50d   : > { %s1968_s27 = scalar_lea.hbm %s2956_s17, 16 }
 0x50e   : > { %p1969_p2 = scmp.ne.s32.totalorder %s2956_s17, %s1968_s27  ;;  %p1974_p1 = scmp.lt.u32.totalorder %s1968_s27, %s2956_s17 }
 0x510   : > { %p1970_p8 = pnand %p1969_p2, %p2708_p7 }
 0x512   : > { %p1971_p10 = pneg %p1970_p8 }
 0x514   : > { %p1976_p3 = pnand %p1974_p1, %p1971_p10 }
 0x516   : > { %1979 = shalt.err (!%p1976_p3)
}
 0x517   : > { %1580 = dma.vmem_to_hbm [thread:$0]  (%p2708_p7), %s1195_s9, 16, %s2956_s17, [#allocation22]  }
 0x518   : > { %s1980_s14 = scalar_lea.vmem %s1217_s24, 16  ;;  %s1986_s0 = scalar_lea.vmem %s1217_s24, 32 }
 0x519   : > { %p1981_p11 = scmp.ne.s32.totalorder %s1217_s24, %s1980_s14  ;;  %p1987_p6 = scmp.lt.s32.totalorder %s1217_s24, %s1217_s24 }
 0x51a   : > { %p1988_p5 = scmp.lt.s32.totalorder %s1986_s0, %s1980_s14 }
 0x51b   : > { %p1982_p9 = pnand %p1981_p11, %p2708_p7 }
 0x51c   : > { %p1989_p12 = por %p1988_p5, %p1987_p6 }
 0x51d   : > { %p1983_p4 = pneg %p1982_p9 }
 0x51f   : > { %p1990_p13 = pnand %p1989_p12, %p1983_p4 }
 0x521   : > { %1993 = shalt.err (!%p1990_p13)
}
 0x522   : > { %s2957_s30 = sld [smem:[#allocation51_spill]] }
 0x528   : > { %s2958_s4 = smov %s2957_s30  ;;  %s1994_s27 = scalar_lea.hbm %s2957_s30, 16 }
 0x529   : > { %p1995_p0 = scmp.ne.s32.totalorder %s2958_s4, %s1994_s27  ;;  %p2000_p10 = scmp.lt.u32.totalorder %s1994_s27, %s2958_s4 }
 0x52b   : > { %p1996_p2 = pnand %p1995_p0, %p2708_p7 }
 0x52d   : > { %p1997_p8 = pneg %p1996_p2 }
 0x52f   : > { %p2002_p1 = pnand %p2000_p10, %p1997_p8 }
 0x531   : > { %2005 = shalt.err (!%p2002_p1)
}
 0x532   : > { %1584 = dma.vmem_to_hbm [thread:$0]  (%p2708_p7), %s1217_s24, 16, %s2958_s4, [#allocation25]  }
 0x533   : > { %s2228_s14 = smov [#allocation20]   ;;  %s2229_s16 = smov [#allocation23]  }
 0x534   : > { %s1183_s0 = sshll.u32 %s2228_s14, 4  ;;  %s1205_s25 = sshll.u32 %s2229_s16, 4  ;;  %s1184_s0 = int_to_ptr.vmem [resolvable:$true] %s1183_s0  ;;  %s2748_s25 = int_to_ptr.vmem [resolvable:$true] %s1205_s25 }
 0x535   : > { %s2006_s30 = scalar_lea.vmem %s1184_s0, 16  ;;  %s2012_s27 = scalar_lea.vmem %s1184_s0, 32 }
 0x536   : > { %p2007_p3 = scmp.ne.s32.totalorder %s1184_s0, %s2006_s30  ;;  %p2013_p4 = scmp.lt.s32.totalorder %s1184_s0, %s1184_s0 }
 0x537   : > { %p2014_p6 = scmp.lt.s32.totalorder %s2012_s27, %s2006_s30 }
 0x538   : > { %p2008_p11 = pnand %p2007_p3, %p2708_p7 }
 0x539   : > { %p2015_p5 = por %p2014_p6, %p2013_p4 }
 0x53a   : > { %p2009_p9 = pneg %p2008_p11 }
 0x53c   : > { %p2016_p12 = pnand %p2015_p5, %p2009_p9 }
 0x53e   : > { %2019 = shalt.err (!%p2016_p12)
}
 0x53f   : > { %s2959_s12 = sld [smem:[#allocation48_spill]] }
 0x545   : > { %s2020_s9 = scalar_lea.hbm %s2959_s12, 16 }
 0x546   : > { %p2021_p13 = scmp.ne.s32.totalorder %s2959_s12, %s2020_s9  ;;  %p2026_p8 = scmp.lt.u32.totalorder %s2020_s9, %s2959_s12 }
 0x548   : > { %p2022_p0 = pnand %p2021_p13, %p2708_p7 }
 0x54a   : > { %p2023_p2 = pneg %p2022_p0 }
 0x54c   : > { %p2028_p10 = pnand %p2026_p8, %p2023_p2 }
 0x54e   : > { %2031 = shalt.err (!%p2028_p10)
}
 0x54f   : > { %1578 = dma.vmem_to_hbm [thread:$0]  (%p2708_p7), %s1184_s0, 16, %s2959_s12, [#allocation10]  }
 0x550   : > { %s2032_s27 = scalar_lea.vmem %s2748_s25, 16  ;;  %s2038_s18 = scalar_lea.vmem %s2748_s25, 32 }
 0x551   : > { %p2033_p1 = scmp.ne.s32.totalorder %s2748_s25, %s2032_s27  ;;  %p2039_p9 = scmp.lt.s32.totalorder %s2748_s25, %s2748_s25 }
 0x552   : > { %p2040_p4 = scmp.lt.s32.totalorder %s2038_s18, %s2032_s27 }
 0x553   : > { %p2034_p3 = pnand %p2033_p1, %p2708_p7 }
 0x554   : > { %p2041_p6 = por %p2040_p4, %p2039_p9 }
 0x555   : > { %p2035_p11 = pneg %p2034_p3 }
 0x557   : > { %p2042_p5 = pnand %p2041_p6, %p2035_p11 }
 0x559   : > { %2045 = shalt.err (!%p2042_p5)
}
 0x55a   : > { %s2960_s10 = sld [smem:[#allocation50_spill]] }
 0x560   : > { %s2046_s2 = scalar_lea.hbm %s2960_s10, 16 }
 0x561   : > { %p2047_p12 = scmp.ne.s32.totalorder %s2960_s10, %s2046_s2  ;;  %p2052_p2 = scmp.lt.u32.totalorder %s2046_s2, %s2960_s10 }
 0x563   : > { %p2048_p13 = pnand %p2047_p12, %p2708_p7 }
 0x565   : > { %p2049_p0 = pneg %p2048_p13 }
 0x567   : > { %p2054_p8 = pnand %p2052_p2, %p2049_p0 }
 0x569   : > { %2057 = shalt.err (!%p2054_p8)
}
 0x56a   : > { %1582 = dma.vmem_to_hbm [thread:$0]  (%p2708_p7), %s2748_s25, 16, %s2960_s10, [#allocation22]  }
 0x56b   : > { %s2230_s18 = smov [#allocation26]   ;;  %s2231_s9 = smov [#allocation27]  }
 0x56c   : > { %s1227_s24 = sshll.u32 %s2230_s18, 4  ;;  %s1238_s15 = sshll.u32 %s2231_s9, 4  ;;  %s1228_s24 = int_to_ptr.vmem [resolvable:$true] %s1227_s24  ;;  %s2792_s15 = int_to_ptr.vmem [resolvable:$true] %s1238_s15 }
 0x56d   : > { %s2058_s14 = scalar_lea.vmem %s1228_s24, 16  ;;  %s2064_s2 = scalar_lea.vmem %s1228_s24, 32 }
 0x56e   : > { %p2059_p10 = scmp.ne.s32.totalorder %s1228_s24, %s2058_s14  ;;  %p2065_p11 = scmp.lt.s32.totalorder %s1228_s24, %s1228_s24 }
 0x56f   : > { %p2066_p9 = scmp.lt.s32.totalorder %s2064_s2, %s2058_s14 }
 0x570   : > { %p2060_p1 = pnand %p2059_p10, %p2708_p7 }
 0x571   : > { %p2067_p4 = por %p2066_p9, %p2065_p11 }
 0x572   : > { %p2061_p3 = pneg %p2060_p1 }
 0x574   : > { %p2068_p6 = pnand %p2067_p4, %p2061_p3 }
 0x576   : > { %2071 = shalt.err (!%p2068_p6)
}
 0x577   : > { %s2961_s16 = sld [smem:[#allocation52_spill]] }
 0x57d   : > { %s2072_s30 = scalar_lea.hbm %s2961_s16, 16 }
 0x57e   : > { %p2073_p5 = scmp.ne.s32.totalorder %s2961_s16, %s2072_s30  ;;  %p2078_p0 = scmp.lt.u32.totalorder %s2072_s30, %s2961_s16 }
 0x580   : > { %p2074_p12 = pnand %p2073_p5, %p2708_p7 }
 0x582   : > { %p2075_p13 = pneg %p2074_p12 }
 0x584   : > { %p2080_p2 = pnand %p2078_p0, %p2075_p13 }
 0x586   : > { %2083 = shalt.err (!%p2080_p2)
}
 0x587   : > { %1586 = dma.vmem_to_hbm [thread:$0]  (%p2708_p7), %s1228_s24, 16, %s2961_s16, [#allocation25]  }
 0x588   : > { %s2084_s0 = scalar_lea.vmem %s2792_s15, 16  ;;  %s2090_s4 = scalar_lea.vmem %s2792_s15, 32 }
 0x589   : > { %p2085_p8 = scmp.ne.s32.totalorder %s2792_s15, %s2084_s0  ;;  %p2091_p3 = scmp.lt.s32.totalorder %s2792_s15, %s2792_s15 }
 0x58a   : > { %p2092_p11 = scmp.lt.s32.totalorder %s2090_s4, %s2084_s0 }
 0x58b   : > { %p2086_p10 = pnand %p2085_p8, %p2708_p7 }
 0x58c   : > { %p2093_p9 = por %p2092_p11, %p2091_p3 }
 0x58d   : > { %p2087_p1 = pneg %p2086_p10 }
 0x58f   : > { %p2094_p4 = pnand %p2093_p9, %p2087_p1 }
 0x591   : > { %2097 = shalt.err (!%p2094_p4)
}
 0x592   : > { %s2962_s27 = sld [smem:[#allocation53_spill]] }
 0x598   : > { %s2963_s18 = smov %s2962_s27  ;;  %s2098_s9 = scalar_lea.hbm %s2962_s27, 16 }
 0x599   : > { %p2099_p6 = scmp.ne.s32.totalorder %s2963_s18, %s2098_s9  ;;  %p2104_p13 = scmp.lt.u32.totalorder %s2098_s9, %s2963_s18 }
 0x59b   : > { %p2100_p5 = pnand %p2099_p6, %p2708_p7 }
 0x59d   : > { %p2101_p12 = pneg %p2100_p5 }
 0x59f   : > { %p2106_p0 = pnand %p2104_p13, %p2101_p12 }
 0x5a1   : > { %2109 = shalt.err (!%p2106_p0)
}
 0x5a2   : > { %1588 = dma.vmem_to_hbm [thread:$0]  (%p2708_p7), %s2792_s15, 16, %s2963_s18, [#allocation28]  }
 0x5a3   : > { %2159 = dma.done.wait (%p2708_p7), [#allocation10], 16  }
 0x5a4   : > { %2161 = vsyncadd (%p2708_p7), [#allocation10], 4294967280 }
 0x5a5   : > { %2163 = dma.done.wait (%p2708_p7), [#allocation22], 32  }
 0x5a6   : > { %2165 = vsyncadd (%p2708_p7), [#allocation22], 4294967264 }
 0x5a7   : > { %2167 = dma.done.wait (%p2708_p7), [#allocation25], 32  }
 0x5a8   : > { %2169 = vsyncadd (%p2708_p7), [#allocation25], 4294967264 }
 0x5a9   : > { %2171 = dma.done.wait (%p2708_p7), [#allocation28], 16  }
 0x5aa   : > { %2173 = vsyncadd (%p2708_p7), [#allocation28], 4294967280 }
 0x5ab PF: > { %s39_s20 = sadd.s32 1, %s2204_s20   ;;  %s2964_s27 = smov %s2180_s28 }
 0x5ac   : > { %p36_p2 = scmp.ge.s32.totalorder %s39_s20, 11   ;;  %s2965_s28 = smov %s2184_s29 }
 0x5ad   : > { %s2966_s29 = smov %s2540_s3  ;;  %s2967_s30 = smov %s2196_s19 }
 0x5ae   : > { %s2968_s0 = smov %s2200_s1  ;;  %s2969_s19 = smov %s2972_s11 }
 0x5af   : > { %s2970_s1 = smov %s2976_s13  ;;  %38 = sbr.rel (!%p36_p2) target bundleno = 29 (0x1d), region = 205 }
 0x5b6   :  { %1271 = vsyncpa [#allocation9], 1 }
 0x5b7   :  { %1273 = vsyncpa [#allocation9 + $0x1], 1 }
 0x5b8   :  { %1274 = vsyncpa [#allocation12], 1 }
 0x5b9   :  { %1275 = vsyncpa [#allocation15], 1 }
 0x5ba   :  { %1276 = vsyncpa [#allocation18], 1 }
 0x5bb   :  { %1277 = vsyncpa [#allocation10], 1 }
 0x5bc   :  { %1279 = vsyncpa [#allocation10 + $0x1], 1 }
 0x5bd   :  { %1280 = vsyncpa [#allocation22], 1 }
 0x5be   :  { %1281 = vsyncpa [#allocation25], 1 }
 0x5bf   :  { %1282 = vsyncpa [#allocation28], 1 }

</bundles_post_ra>
